<compile_context>
chip_gen: v5e
topology: v5e:2x2
jax: 0.10.0
libtpu: 0.0.40
codegen_flags: <defaults>
</compile_context>

<pallas_src>
import numpy as np
import jax
import jax.numpy as jnp
from jax.experimental import pallas as pl
from jax.experimental.pallas import tpu as pltpu

# ------------- config (mirrors NGPRadianceField.__init__ defaults, small demo) -------------
NUM_DIM = 3
GEO_FEAT_DIM = 15
N_LEVELS = 16
N_FEATS_PER_LEVEL = 2
BASE_RESOLUTION = 16
MAX_RESOLUTION = 4096
LOG2_HASHMAP_SIZE = 12            # module default is 19; shrunk for a small synthetic table
NETWIDTH = 32                     # netwidth in {32,64,128} -> 'FullyFusedMLP'
ENC_DIM = N_LEVELS * N_FEATS_PER_LEVEL        # 32
SH_DIM = 16                       # SphericalHarmonics degree 4 -> 16 coefficients
HEAD_IN_PACKED = SH_DIM + 1 + GEO_FEAT_DIM    # 32 (SH | zero-density slot | geo feats)
TABLE_SIZE = 1 << LOG2_HASHMAP_SIZE
PER_LEVEL_SCALE = float(
    np.exp((np.log(MAX_RESOLUTION) - np.log(BASE_RESOLUTION)) / (N_LEVELS - 1)))
TN = 1024                         # rays per Pallas grid step

_PRIMES = (np.uint32(1), np.uint32(2654435761), np.uint32(805459861))


# --------------------------- glue: multires hash-grid encoding ---------------------------
def hash_grid_encode(x01, table):
    """x01: [N,3] in [0,1]; table: [L, T, F] float32 -> [N, L*F] features."""
    # TODO(synk): hash-table gather stays in plain JAX (no clean Pallas TPU gather);
    # fusing it into the kernel needs a VMEM-gather / per-level DMA plan and does not
    # fit v7x VMEM at the full 2^19-entry table.
    n = x01.shape[0]
    L, T, F = table.shape
    feats = []
    for lvl in range(L):
        scale = BASE_RESOLUTION * (PER_LEVEL_SCALE ** lvl)
        pos = x01 * scale
        pos0f = jnp.floor(pos)
        frac = pos - pos0f
        pos0 = pos0f.astype(jnp.uint32)
        acc = jnp.zeros((n, F), jnp.float32)
        for corner in range(8):
            bits = [(corner >> d) & 1 for d in range(3)]
            c = pos0 + jnp.asarray(bits, dtype=jnp.uint32)
            h = (c[:, 0] * _PRIMES[0]) ^ (c[:, 1] * _PRIMES[1]) ^ (c[:, 2] * _PRIMES[2])
            idx = (h & jnp.uint32(T - 1)).astype(jnp.int32)
            w = jnp.ones((n,), jnp.float32)
            for d in range(3):
                w = w * (frac[:, d] if bits[d] else 1.0 - frac[:, d])
            acc = acc + w[:, None] * table[lvl][idx]
        feats.append(acc)
    return jnp.concatenate(feats, axis=-1)


# --------------------------------- SH degree-4 basis -------------------------------------
def _sh4_terms(x, y, z):
    xy, yz, xz = x * y, y * z, x * z
    x2, y2, z2 = x * x, y * y, z * z
    return [
        jnp.full_like(x, 0.28209479177387814),
        -0.48860251190291987 * y,
        0.48860251190291987 * z,
        -0.48860251190291987 * x,
        1.0925484305920792 * xy,
        -1.0925484305920792 * yz,
        0.94617469575755997 * z2 - 0.31539156525251999,
        -1.0925484305920792 * xz,
        0.54627421529603959 * (x2 - y2),
        0.59004358992664352 * y * (-3.0 * x2 + y2),
        2.8906114426405538 * xy * z,
        0.45704579946446572 * y * (1.0 - 5.0 * z2),
        0.3731763325901154 * z * (5.0 * z2 - 3.0),
        0.45704579946446572 * x * (1.0 - 5.0 * z2),
        1.4453057213202769 * z * (x2 - y2),
        0.59004358992664352 * x * (3.0 * y2 - x2),
    ]


# ----------------------------------- Pallas kernel ---------------------------------------
def _ngp_mlp_kernel(enc_ref, dir_ref, w1t_ref, w2t_ref, wh1t_ref, wh23t_ref, whot_ref,
                    out_ref, head_ref):
    f32 = jnp.float32
    bf16 = jnp.bfloat16

    # mlp_base: FullyFusedMLP(32 -> W -> 16), ReLU hidden, no bias, no output act.
    # Channel-major: activations are [channels, rays] (lane-dense on the ray axis).
    enc_t = enc_ref[...]                                                      # bf16 [32, TN]
    h_t = jnp.maximum(jnp.dot(w1t_ref[...], enc_t, preferred_element_type=f32), 0.0)
    base_t = jnp.dot(w2t_ref[...], h_t.astype(bf16), preferred_element_type=f32)   # f32 [16, TN]

    # density = trunc_exp(raw - 1) == exp(raw - 1) in the forward pass (f32 on the EUP).
    density_t = jnp.exp(base_t[0:1, :] - 1.0)                                 # [1, TN]

    # SH degree-4 view-direction encoding: each term is a [TN]-shaped lane-dense row,
    # written into the packed head-input scratch ([16 SH | raw density | 15 geo]).
    # (PyTorch feeds (dir+1)/2 to tcnn, which internally maps back to [-1,1]; net
    # effect is SH of the raw dir.)
    x = dir_ref[0, :]
    y = dir_ref[1, :]
    z = dir_ref[2, :]
    for i, term in enumerate(_sh4_terms(x, y, z)):
        head_ref[i, :] = term
    head_ref[SH_DIM:, :] = base_t                                             # rows 16..31

    # mlp_head: FullyFusedMLP(31 -> W -> W -> W -> 3); layer-1 weight is packed to 32
    # rows with a zero row for the raw-density channel, reproducing
    # torch.cat([d, embedding], -1) @ W_head1 with a single MXU dot.
    head_in = head_ref[...].astype(bf16)                                      # [32, TN]
    h1 = jnp.maximum(jnp.dot(wh1t_ref[...], head_in, preferred_element_type=f32), 0.0)
    h2 = jnp.maximum(jnp.dot(wh23t_ref[0], h1.astype(bf16), preferred_element_type=f32), 0.0)
    h3 = jnp.maximum(jnp.dot(wh23t_ref[1], h2.astype(bf16), preferred_element_type=f32), 0.0)
    rgb_t = jax.nn.sigmoid(jnp.dot(whot_ref[...], h3.astype(bf16),
                                   preferred_element_type=f32))               # f32 [3, TN]

    # fused lane-dense output block: rows 0..2 = rgb, row 3 = density.
    out_ref[0:3, :] = rgb_t
    out_ref[3:4, :] = density_t


# ------------------------------------- wrapper -------------------------------------------
@jax.jit
def ngp_forward(positions, directions, params):
    aabb = params["aabb"]
    x01 = (positions - aabb[:NUM_DIM]) / (aabb[NUM_DIM:] - aabb[:NUM_DIM])
    enc = hash_grid_encode(x01, params["hash_table"]).astype(jnp.bfloat16)    # [N, 32] bf16

    n = positions.shape[0]
    n_pad = ((n + TN - 1) // TN) * TN
    pad = n_pad - n

    # channel-major inputs for the kernel (ray axis -> lanes)
    enc_t = jnp.pad(enc.T, ((0, 0), (0, pad)))                                # bf16 [32, n_pad]
    dir_t = jnp.pad(directions.astype(jnp.float32).T, ((0, 0), (0, pad)))     # f32  [3, n_pad]

    # weights, pre-transposed so every matmul is W(Cout,K) @ act(K,TN)
    w1t = params["w1"].T                                                      # (W, 32)
    w2t = params["w2"].T                                                      # (16, W)
    wh1t = params["wh1"].T                                                    # (W, 32)
    wh23t = jnp.transpose(params["wh23"], (0, 2, 1))                          # (2, W, W)
    whot = params["who"].T                                                    # (3, W)

    W = NETWIDTH
    weight_bytes = sum(int(np.prod(params[k].shape)) * 2
                       for k in ("w1", "w2", "wh1", "wh23", "who"))
    cost = pl.CostEstimate(
        flops=int(2 * n_pad * (ENC_DIM * W + W * (1 + GEO_FEAT_DIM)
                               + HEAD_IN_PACKED * W + 2 * W * W + W * 3)),
        transcendentals=int(4 * n_pad),                      # exp + 3x sigmoid per ray
        bytes_accessed=int(n_pad * (ENC_DIM * 2 + 3 * 4 + 4 * 4) + weight_bytes))

    def col_spec(c):
        return pl.BlockSpec((c, TN), lambda i: (0, i))

    def full_spec(shape):
        nd = len(shape)
        return pl.BlockSpec(shape, lambda i: (0,) * nd)

    out = pl.pallas_call(
        _ngp_mlp_kernel,
        out_shape=jax.ShapeDtypeStruct((4, n_pad), jnp.float32),
        grid_spec=pltpu.PrefetchScalarGridSpec(
            num_scalar_prefetch=0,
            grid=(n_pad // TN,),
            in_specs=[
                col_spec(ENC_DIM),                  # enc_t
                col_spec(3),                        # dir_t
                full_spec(w1t.shape),
                full_spec(w2t.shape),
                full_spec(wh1t.shape),
                full_spec(wh23t.shape),
                full_spec(whot.shape),
            ],
            out_specs=col_spec(4),
            scratch_shapes=[pltpu.VMEM((HEAD_IN_PACKED, TN), jnp.float32)],
        ),
        compiler_params=pltpu.CompilerParams(dimension_semantics=("parallel",)),
        cost_estimate=cost,
    )(enc_t, dir_t, w1t, w2t, wh1t, wh23t, whot)

    rgb = out[0:3, :n].T
    density = out[3:4, :n].T
    return rgb, density


# ----------------------------- deterministic parameter init ------------------------------
def init_params(key):
    ks = jax.random.split(key, 7)

    def dense(k, shape, fan_in):
        return (jax.random.normal(k, shape, jnp.float32) / np.sqrt(fan_in)).astype(jnp.bfloat16)

    table = jax.random.uniform(ks[0], (N_LEVELS, TABLE_SIZE, N_FEATS_PER_LEVEL),
                               jnp.float32, minval=-0.1, maxval=0.1)
    w1 = dense(ks[1], (ENC_DIM, NETWIDTH), ENC_DIM)
    w2 = dense(ks[2], (NETWIDTH, 1 + GEO_FEAT_DIM), NETWIDTH)
    wh1_full = dense(ks[3], (SH_DIM + GEO_FEAT_DIM, NETWIDTH), SH_DIM + GEO_FEAT_DIM)  # (31, W)
    # packed head layer-1 weight: [16 SH rows | zero row for raw density | 15 geo rows]
    wh1 = jnp.concatenate(
        [wh1_full[:SH_DIM],
         jnp.zeros((1, NETWIDTH), jnp.bfloat16),
         wh1_full[SH_DIM:]], axis=0)                                    # (32, W)
    wh2 = dense(ks[4], (NETWIDTH, NETWIDTH), NETWIDTH)
    wh3 = dense(ks[5], (NETWIDTH, NETWIDTH), NETWIDTH)
    wh23 = jnp.stack([wh2, wh3], axis=0)                                # (2, W, W)
    who = dense(ks[6], (NETWIDTH, 3), NETWIDTH)

    # aabb processing as in __init__ (center / max-size cube)
    aabb_raw = jnp.array([-1.0, -1.0, -1.0, 1.0, 1.0, 1.0], jnp.float32)
    center = (aabb_raw[:NUM_DIM] + aabb_raw[NUM_DIM:]) / 2.0
    size = jnp.max(aabb_raw[NUM_DIM:] - aabb_raw[:NUM_DIM])
    aabb = jnp.concatenate([center - size / 2.0, center + size / 2.0], axis=-1)

    return dict(hash_table=table, w1=w1, w2=w2, wh1=wh1, wh23=wh23, who=who, aabb=aabb)


# ------------------------------ pure-JAX reference (check) -------------------------------
def reference_forward(positions, directions, params):
    f32, bf16 = jnp.float32, jnp.bfloat16
    aabb = params["aabb"]
    x01 = (positions - aabb[:NUM_DIM]) / (aabb[NUM_DIM:] - aabb[:NUM_DIM])
    enc = hash_grid_encode(x01, params["hash_table"]).astype(bf16)
    h = jnp.maximum(jnp.dot(enc, params["w1"], preferred_element_type=f32), 0.0)
    base_out = jnp.dot(h.astype(bf16), params["w2"], preferred_element_type=f32)
    density = jnp.exp(base_out[:, 0:1] - 1.0)
    sh = jnp.concatenate(
        _sh4_terms(directions[:, 0:1], directions[:, 1:2], directions[:, 2:3]), axis=-1)
    head_in = jnp.concatenate([sh, base_out], axis=-1)
    h1 = jnp.maximum(jnp.dot(head_in.astype(bf16), params["wh1"],
                             preferred_element_type=f32), 0.0)
    h2 = jnp.maximum(jnp.dot(h1.astype(bf16), params["wh23"][0],
                             preferred_element_type=f32), 0.0)
    h3 = jnp.maximum(jnp.dot(h2.astype(bf16), params["wh23"][1],
                             preferred_element_type=f32), 0.0)
    rgb = jax.nn.sigmoid(jnp.dot(h3.astype(bf16), params["who"],
                                 preferred_element_type=f32))
    return rgb, density


if __name__ == "__main__":
    key = jax.random.PRNGKey(0)
    kpos, kdir, kpar = jax.random.split(key, 3)
    N = 2500   # deliberately not a multiple of TN: exercises the padding + multi-block grid
    positions = jax.random.uniform(kpos, (N, NUM_DIM), jnp.float32, minval=-1.0, maxval=1.0)
    directions = jax.random.normal(kdir, (N, NUM_DIM), jnp.float32)
    directions = directions / jnp.linalg.norm(directions, axis=-1, keepdims=True)
    params = init_params(kpar)

    rgb, density = ngp_forward(positions, directions, params)
    jax.block_until_ready((rgb, density))

    rgb_ref, den_ref = reference_forward(positions, directions, params)
    err = max(float(jnp.max(jnp.abs(rgb - rgb_ref))),
              float(jnp.max(jnp.abs(density - den_ref))))

    assert rgb.shape == (N, 3) and density.shape == (N, 1)
    assert bool(jnp.all(jnp.isfinite(rgb))) and bool(jnp.all(jnp.isfinite(density)))
    assert err < 1e-2, f"Pallas vs JAX reference mismatch: {err}"
    print("KERNEL_OK")
</pallas_src>

<mosaic_0001>
module attributes {stable_mosaic.version = 11 : i64} {
  func.func @_ngp_mlp_kernel(%arg0: i32, %arg1: memref<32x1024xbf16, #tpu.memory_space<vmem>>, %arg2: memref<3x1024xf32, #tpu.memory_space<vmem>>, %arg3: memref<32x32xbf16, #tpu.memory_space<vmem>>, %arg4: memref<16x32xbf16, #tpu.memory_space<vmem>>, %arg5: memref<32x32xbf16, #tpu.memory_space<vmem>>, %arg6: memref<2x32x32xbf16, #tpu.memory_space<vmem>>, %arg7: memref<3x32xbf16, #tpu.memory_space<vmem>>, %arg8: memref<4x1024xf32, #tpu.memory_space<vmem>>, %arg9: memref<32x1024xf32, #tpu.memory_space<vmem>>) attributes {dimension_semantics = [#tpu.dimension_semantics<parallel>], iteration_bounds = array<i64: 3>, scalar_prefetch = 0 : i64, scratch_operands = 1 : i64, tpu.core_type = #tpu.core_type<tc>, window_params = [{transform_indices = @transform_0, window_bounds = array<i64: 32, 1024>}, {transform_indices = @transform_1, window_bounds = array<i64: 3, 1024>}, {pipeline_mode = #tpu.pipeline_mode<synchronous>, transform_indices = @transform_2, window_bounds = array<i64: 32, 32>}, {pipeline_mode = #tpu.pipeline_mode<synchronous>, transform_indices = @transform_3, window_bounds = array<i64: 16, 32>}, {pipeline_mode = #tpu.pipeline_mode<synchronous>, transform_indices = @transform_4, window_bounds = array<i64: 32, 32>}, {pipeline_mode = #tpu.pipeline_mode<synchronous>, transform_indices = @transform_5, window_bounds = array<i64: 2, 32, 32>}, {pipeline_mode = #tpu.pipeline_mode<synchronous>, transform_indices = @transform_6, window_bounds = array<i64: 3, 32>}, {transform_indices = @transform_7, window_bounds = array<i64: 4, 1024>}]} {
    %c0 = arith.constant 0 : index
    %c0_0 = arith.constant 0 : index
    %0 = vector.load %arg1[%c0, %c0_0] : memref<32x1024xbf16, #tpu.memory_space<vmem>>, vector<32x1024xbf16>
    %c0_1 = arith.constant 0 : index
    %c0_2 = arith.constant 0 : index
    %1 = vector.load %arg3[%c0_1, %c0_2] : memref<32x32xbf16, #tpu.memory_space<vmem>>, vector<32x32xbf16>
    %cst = arith.constant dense<0.000000e+00> : vector<32x1024xf32>
    %2 = tpu.matmul %1, %0, %cst {dimension_numbers = #tpu.dot_dimension_numbers<[1], [0], [0], [1], [0, 0, 1, 1], [], []>} : vector<32x32xbf16>, vector<32x1024xbf16>, vector<32x1024xf32> -> vector<32x1024xf32>
    %cst_3 = arith.constant 0.000000e+00 : f32
    %3 = vector.broadcast %cst_3 : f32 to vector<32x1024xf32>
    %4 = arith.maximumf %2, %3 : vector<32x1024xf32>
    %c0_4 = arith.constant 0 : index
    %c0_5 = arith.constant 0 : index
    %5 = vector.load %arg4[%c0_4, %c0_5] : memref<16x32xbf16, #tpu.memory_space<vmem>>, vector<16x32xbf16>
    %6 = arith.truncf %4 : vector<32x1024xf32> to vector<32x1024xbf16>
    %cst_6 = arith.constant dense<0.000000e+00> : vector<16x1024xf32>
    %7 = tpu.matmul %5, %6, %cst_6 {dimension_numbers = #tpu.dot_dimension_numbers<[1], [0], [0], [1], [0, 0, 1, 1], [], []>} : vector<16x32xbf16>, vector<32x1024xbf16>, vector<16x1024xf32> -> vector<16x1024xf32>
    %8 = vector.extract_strided_slice %7 {offsets = [0, 0], sizes = [1, 1024], strides = [1, 1]} : vector<16x1024xf32> to vector<1x1024xf32>
    %cst_7 = arith.constant 1.000000e+00 : f32
    %9 = vector.broadcast %cst_7 : f32 to vector<1x1024xf32>
    %10 = arith.subf %8, %9 : vector<1x1024xf32>
    %11 = math.exp %10 : vector<1x1024xf32>
    %c0_8 = arith.constant 0 : index
    %c0_9 = arith.constant 0 : index
    %12 = vector.load %arg2[%c0_8, %c0_9] : memref<3x1024xf32, #tpu.memory_space<vmem>>, vector<1x1024xf32>
    %13 = vector.shape_cast %12 : vector<1x1024xf32> to vector<1024xf32>
    %c1 = arith.constant 1 : index
    %c0_10 = arith.constant 0 : index
    %14 = vector.load %arg2[%c1, %c0_10] : memref<3x1024xf32, #tpu.memory_space<vmem>>, vector<1x1024xf32>
    %15 = vector.shape_cast %14 : vector<1x1024xf32> to vector<1024xf32>
    %c2 = arith.constant 2 : index
    %c0_11 = arith.constant 0 : index
    %16 = vector.load %arg2[%c2, %c0_11] : memref<3x1024xf32, #tpu.memory_space<vmem>>, vector<1x1024xf32>
    %17 = vector.shape_cast %16 : vector<1x1024xf32> to vector<1024xf32>
    %18 = arith.mulf %13, %15 : vector<1024xf32>
    %19 = arith.mulf %15, %17 : vector<1024xf32>
    %20 = arith.mulf %13, %17 : vector<1024xf32>
    %21 = arith.mulf %13, %13 : vector<1024xf32>
    %22 = arith.mulf %15, %15 : vector<1024xf32>
    %23 = arith.mulf %17, %17 : vector<1024xf32>
    %cst_12 = arith.constant 0.282094806 : f32
    %24 = vector.broadcast %cst_12 : f32 to vector<1024xf32>
    %cst_13 = arith.constant -0.488602519 : f32
    %25 = vector.broadcast %cst_13 : f32 to vector<1024xf32>
    %26 = arith.mulf %25, %15 : vector<1024xf32>
    %cst_14 = arith.constant 0.488602519 : f32
    %27 = vector.broadcast %cst_14 : f32 to vector<1024xf32>
    %28 = arith.mulf %27, %17 : vector<1024xf32>
    %cst_15 = arith.constant -0.488602519 : f32
    %29 = vector.broadcast %cst_15 : f32 to vector<1024xf32>
    %30 = arith.mulf %29, %13 : vector<1024xf32>
    %cst_16 = arith.constant 1.09254849 : f32
    %31 = vector.broadcast %cst_16 : f32 to vector<1024xf32>
    %32 = arith.mulf %31, %18 : vector<1024xf32>
    %cst_17 = arith.constant -1.09254849 : f32
    %33 = vector.broadcast %cst_17 : f32 to vector<1024xf32>
    %34 = arith.mulf %33, %19 : vector<1024xf32>
    %cst_18 = arith.constant 0.946174681 : f32
    %35 = vector.broadcast %cst_18 : f32 to vector<1024xf32>
    %36 = arith.mulf %35, %23 : vector<1024xf32>
    %cst_19 = arith.constant 0.31539157 : f32
    %37 = vector.broadcast %cst_19 : f32 to vector<1024xf32>
    %38 = arith.subf %36, %37 : vector<1024xf32>
    %cst_20 = arith.constant -1.09254849 : f32
    %39 = vector.broadcast %cst_20 : f32 to vector<1024xf32>
    %40 = arith.mulf %39, %20 : vector<1024xf32>
    %41 = arith.subf %21, %22 : vector<1024xf32>
    %cst_21 = arith.constant 0.546274245 : f32
    %42 = vector.broadcast %cst_21 : f32 to vector<1024xf32>
    %43 = arith.mulf %42, %41 : vector<1024xf32>
    %cst_22 = arith.constant 0.590043604 : f32
    %44 = vector.broadcast %cst_22 : f32 to vector<1024xf32>
    %45 = arith.mulf %44, %15 : vector<1024xf32>
    %cst_23 = arith.constant -3.000000e+00 : f32
    %46 = vector.broadcast %cst_23 : f32 to vector<1024xf32>
    %47 = arith.mulf %46, %21 : vector<1024xf32>
    %48 = arith.addf %47, %22 : vector<1024xf32>
    %49 = arith.mulf %45, %48 : vector<1024xf32>
    %cst_24 = arith.constant 2.89061141 : f32
    %50 = vector.broadcast %cst_24 : f32 to vector<1024xf32>
    %51 = arith.mulf %50, %18 : vector<1024xf32>
    %52 = arith.mulf %51, %17 : vector<1024xf32>
    %cst_25 = arith.constant 0.457045794 : f32
    %53 = vector.broadcast %cst_25 : f32 to vector<1024xf32>
    %54 = arith.mulf %53, %15 : vector<1024xf32>
    %cst_26 = arith.constant 5.000000e+00 : f32
    %55 = vector.broadcast %cst_26 : f32 to vector<1024xf32>
    %56 = arith.mulf %55, %23 : vector<1024xf32>
    %cst_27 = arith.constant 1.000000e+00 : f32
    %57 = vector.broadcast %cst_27 : f32 to vector<1024xf32>
    %58 = arith.subf %57, %56 : vector<1024xf32>
    %59 = arith.mulf %54, %58 : vector<1024xf32>
    %cst_28 = arith.constant 0.373176336 : f32
    %60 = vector.broadcast %cst_28 : f32 to vector<1024xf32>
    %61 = arith.mulf %60, %17 : vector<1024xf32>
    %cst_29 = arith.constant 5.000000e+00 : f32
    %62 = vector.broadcast %cst_29 : f32 to vector<1024xf32>
    %63 = arith.mulf %62, %23 : vector<1024xf32>
    %cst_30 = arith.constant 3.000000e+00 : f32
    %64 = vector.broadcast %cst_30 : f32 to vector<1024xf32>
    %65 = arith.subf %63, %64 : vector<1024xf32>
    %66 = arith.mulf %61, %65 : vector<1024xf32>
    %cst_31 = arith.constant 0.457045794 : f32
    %67 = vector.broadcast %cst_31 : f32 to vector<1024xf32>
    %68 = arith.mulf %67, %13 : vector<1024xf32>
    %cst_32 = arith.constant 5.000000e+00 : f32
    %69 = vector.broadcast %cst_32 : f32 to vector<1024xf32>
    %70 = arith.mulf %69, %23 : vector<1024xf32>
    %cst_33 = arith.constant 1.000000e+00 : f32
    %71 = vector.broadcast %cst_33 : f32 to vector<1024xf32>
    %72 = arith.subf %71, %70 : vector<1024xf32>
    %73 = arith.mulf %68, %72 : vector<1024xf32>
    %cst_34 = arith.constant 1.44530571 : f32
    %74 = vector.broadcast %cst_34 : f32 to vector<1024xf32>
    %75 = arith.mulf %74, %17 : vector<1024xf32>
    %76 = arith.subf %21, %22 : vector<1024xf32>
    %77 = arith.mulf %75, %76 : vector<1024xf32>
    %cst_35 = arith.constant 0.590043604 : f32
    %78 = vector.broadcast %cst_35 : f32 to vector<1024xf32>
    %79 = arith.mulf %78, %13 : vector<1024xf32>
    %cst_36 = arith.constant 3.000000e+00 : f32
    %80 = vector.broadcast %cst_36 : f32 to vector<1024xf32>
    %81 = arith.mulf %80, %22 : vector<1024xf32>
    %82 = arith.subf %81, %21 : vector<1024xf32>
    %83 = arith.mulf %79, %82 : vector<1024xf32>
    %c0_37 = arith.constant 0 : index
    %c0_38 = arith.constant 0 : index
    %84 = vector.load %arg9[%c0_37, %c0_38] : memref<32x1024xf32, #tpu.memory_space<vmem>>, vector<1x1024xf32>
    %85 = vector.shape_cast %84 : vector<1x1024xf32> to vector<1024xf32>
    %86 = vector.shape_cast %24 : vector<1024xf32> to vector<1x1024xf32>
    tpu.vector_store %arg9[%c0_37, %c0_38], %86 {strides = array<i32>} : memref<32x1024xf32, #tpu.memory_space<vmem>>, vector<1x1024xf32>,
    %c1_39 = arith.constant 1 : index
    %c0_40 = arith.constant 0 : index
    %87 = vector.load %arg9[%c1_39, %c0_40] : memref<32x1024xf32, #tpu.memory_space<vmem>>, vector<1x1024xf32>
    %88 = vector.shape_cast %87 : vector<1x1024xf32> to vector<1024xf32>
    %89 = vector.shape_cast %26 : vector<1024xf32> to vector<1x1024xf32>
    tpu.vector_store %arg9[%c1_39, %c0_40], %89 {strides = array<i32>} : memref<32x1024xf32, #tpu.memory_space<vmem>>, vector<1x1024xf32>,
    %c2_41 = arith.constant 2 : index
    %c0_42 = arith.constant 0 : index
    %90 = vector.load %arg9[%c2_41, %c0_42] : memref<32x1024xf32, #tpu.memory_space<vmem>>, vector<1x1024xf32>
    %91 = vector.shape_cast %90 : vector<1x1024xf32> to vector<1024xf32>
    %92 = vector.shape_cast %28 : vector<1024xf32> to vector<1x1024xf32>
    tpu.vector_store %arg9[%c2_41, %c0_42], %92 {strides = array<i32>} : memref<32x1024xf32, #tpu.memory_space<vmem>>, vector<1x1024xf32>,
    %c3 = arith.constant 3 : index
    %c0_43 = arith.constant 0 : index
    %93 = vector.load %arg9[%c3, %c0_43] : memref<32x1024xf32, #tpu.memory_space<vmem>>, vector<1x1024xf32>
    %94 = vector.shape_cast %93 : vector<1x1024xf32> to vector<1024xf32>
    %95 = vector.shape_cast %30 : vector<1024xf32> to vector<1x1024xf32>
    tpu.vector_store %arg9[%c3, %c0_43], %95 {strides = array<i32>} : memref<32x1024xf32, #tpu.memory_space<vmem>>, vector<1x1024xf32>,
    %c4 = arith.constant 4 : index
    %c0_44 = arith.constant 0 : index
    %96 = vector.load %arg9[%c4, %c0_44] : memref<32x1024xf32, #tpu.memory_space<vmem>>, vector<1x1024xf32>
    %97 = vector.shape_cast %96 : vector<1x1024xf32> to vector<1024xf32>
    %98 = vector.shape_cast %32 : vector<1024xf32> to vector<1x1024xf32>
    tpu.vector_store %arg9[%c4, %c0_44], %98 {strides = array<i32>} : memref<32x1024xf32, #tpu.memory_space<vmem>>, vector<1x1024xf32>,
    %c5 = arith.constant 5 : index
    %c0_45 = arith.constant 0 : index
    %99 = vector.load %arg9[%c5, %c0_45] : memref<32x1024xf32, #tpu.memory_space<vmem>>, vector<1x1024xf32>
    %100 = vector.shape_cast %99 : vector<1x1024xf32> to vector<1024xf32>
    %101 = vector.shape_cast %34 : vector<1024xf32> to vector<1x1024xf32>
    tpu.vector_store %arg9[%c5, %c0_45], %101 {strides = array<i32>} : memref<32x1024xf32, #tpu.memory_space<vmem>>, vector<1x1024xf32>,
    %c6 = arith.constant 6 : index
    %c0_46 = arith.constant 0 : index
    %102 = vector.load %arg9[%c6, %c0_46] : memref<32x1024xf32, #tpu.memory_space<vmem>>, vector<1x1024xf32>
    %103 = vector.shape_cast %102 : vector<1x1024xf32> to vector<1024xf32>
    %104 = vector.shape_cast %38 : vector<1024xf32> to vector<1x1024xf32>
    tpu.vector_store %arg9[%c6, %c0_46], %104 {strides = array<i32>} : memref<32x1024xf32, #tpu.memory_space<vmem>>, vector<1x1024xf32>,
    %c7 = arith.constant 7 : index
    %c0_47 = arith.constant 0 : index
    %105 = vector.load %arg9[%c7, %c0_47] : memref<32x1024xf32, #tpu.memory_space<vmem>>, vector<1x1024xf32>
    %106 = vector.shape_cast %105 : vector<1x1024xf32> to vector<1024xf32>
    %107 = vector.shape_cast %40 : vector<1024xf32> to vector<1x1024xf32>
    tpu.vector_store %arg9[%c7, %c0_47], %107 {strides = array<i32>} : memref<32x1024xf32, #tpu.memory_space<vmem>>, vector<1x1024xf32>,
    %c8 = arith.constant 8 : index
    %c0_48 = arith.constant 0 : index
    %108 = vector.load %arg9[%c8, %c0_48] : memref<32x1024xf32, #tpu.memory_space<vmem>>, vector<1x1024xf32>
    %109 = vector.shape_cast %108 : vector<1x1024xf32> to vector<1024xf32>
    %110 = vector.shape_cast %43 : vector<1024xf32> to vector<1x1024xf32>
    tpu.vector_store %arg9[%c8, %c0_48], %110 {strides = array<i32>} : memref<32x1024xf32, #tpu.memory_space<vmem>>, vector<1x1024xf32>,
    %c9 = arith.constant 9 : index
    %c0_49 = arith.constant 0 : index
    %111 = vector.load %arg9[%c9, %c0_49] : memref<32x1024xf32, #tpu.memory_space<vmem>>, vector<1x1024xf32>
    %112 = vector.shape_cast %111 : vector<1x1024xf32> to vector<1024xf32>
    %113 = vector.shape_cast %49 : vector<1024xf32> to vector<1x1024xf32>
    tpu.vector_store %arg9[%c9, %c0_49], %113 {strides = array<i32>} : memref<32x1024xf32, #tpu.memory_space<vmem>>, vector<1x1024xf32>,
    %c10 = arith.constant 10 : index
    %c0_50 = arith.constant 0 : index
    %114 = vector.load %arg9[%c10, %c0_50] : memref<32x1024xf32, #tpu.memory_space<vmem>>, vector<1x1024xf32>
    %115 = vector.shape_cast %114 : vector<1x1024xf32> to vector<1024xf32>
    %116 = vector.shape_cast %52 : vector<1024xf32> to vector<1x1024xf32>
    tpu.vector_store %arg9[%c10, %c0_50], %116 {strides = array<i32>} : memref<32x1024xf32, #tpu.memory_space<vmem>>, vector<1x1024xf32>,
    %c11 = arith.constant 11 : index
    %c0_51 = arith.constant 0 : index
    %117 = vector.load %arg9[%c11, %c0_51] : memref<32x1024xf32, #tpu.memory_space<vmem>>, vector<1x1024xf32>
    %118 = vector.shape_cast %117 : vector<1x1024xf32> to vector<1024xf32>
    %119 = vector.shape_cast %59 : vector<1024xf32> to vector<1x1024xf32>
    tpu.vector_store %arg9[%c11, %c0_51], %119 {strides = array<i32>} : memref<32x1024xf32, #tpu.memory_space<vmem>>, vector<1x1024xf32>,
    %c12 = arith.constant 12 : index
    %c0_52 = arith.constant 0 : index
    %120 = vector.load %arg9[%c12, %c0_52] : memref<32x1024xf32, #tpu.memory_space<vmem>>, vector<1x1024xf32>
    %121 = vector.shape_cast %120 : vector<1x1024xf32> to vector<1024xf32>
    %122 = vector.shape_cast %66 : vector<1024xf32> to vector<1x1024xf32>
    tpu.vector_store %arg9[%c12, %c0_52], %122 {strides = array<i32>} : memref<32x1024xf32, #tpu.memory_space<vmem>>, vector<1x1024xf32>,
    %c13 = arith.constant 13 : index
    %c0_53 = arith.constant 0 : index
    %123 = vector.load %arg9[%c13, %c0_53] : memref<32x1024xf32, #tpu.memory_space<vmem>>, vector<1x1024xf32>
    %124 = vector.shape_cast %123 : vector<1x1024xf32> to vector<1024xf32>
    %125 = vector.shape_cast %73 : vector<1024xf32> to vector<1x1024xf32>
    tpu.vector_store %arg9[%c13, %c0_53], %125 {strides = array<i32>} : memref<32x1024xf32, #tpu.memory_space<vmem>>, vector<1x1024xf32>,
    %c14 = arith.constant 14 : index
    %c0_54 = arith.constant 0 : index
    %126 = vector.load %arg9[%c14, %c0_54] : memref<32x1024xf32, #tpu.memory_space<vmem>>, vector<1x1024xf32>
    %127 = vector.shape_cast %126 : vector<1x1024xf32> to vector<1024xf32>
    %128 = vector.shape_cast %77 : vector<1024xf32> to vector<1x1024xf32>
    tpu.vector_store %arg9[%c14, %c0_54], %128 {strides = array<i32>} : memref<32x1024xf32, #tpu.memory_space<vmem>>, vector<1x1024xf32>,
    %c15 = arith.constant 15 : index
    %c0_55 = arith.constant 0 : index
    %129 = vector.load %arg9[%c15, %c0_55] : memref<32x1024xf32, #tpu.memory_space<vmem>>, vector<1x1024xf32>
    %130 = vector.shape_cast %129 : vector<1x1024xf32> to vector<1024xf32>
    %131 = vector.shape_cast %83 : vector<1024xf32> to vector<1x1024xf32>
    tpu.vector_store %arg9[%c15, %c0_55], %131 {strides = array<i32>} : memref<32x1024xf32, #tpu.memory_space<vmem>>, vector<1x1024xf32>,
    %c16 = arith.constant 16 : index
    %c0_56 = arith.constant 0 : index
    %132 = vector.load %arg9[%c16, %c0_56] : memref<32x1024xf32, #tpu.memory_space<vmem>>, vector<16x1024xf32>
    tpu.vector_store %arg9[%c16, %c0_56], %7 {strides = array<i32>} : memref<32x1024xf32, #tpu.memory_space<vmem>>, vector<16x1024xf32>,
    %c0_57 = arith.constant 0 : index
    %c0_58 = arith.constant 0 : index
    %133 = vector.load %arg9[%c0_57, %c0_58] : memref<32x1024xf32, #tpu.memory_space<vmem>>, vector<32x1024xf32>
    %134 = arith.truncf %133 : vector<32x1024xf32> to vector<32x1024xbf16>
    %c0_59 = arith.constant 0 : index
    %c0_60 = arith.constant 0 : index
    %135 = vector.load %arg5[%c0_59, %c0_60] : memref<32x32xbf16, #tpu.memory_space<vmem>>, vector<32x32xbf16>
    %cst_61 = arith.constant dense<0.000000e+00> : vector<32x1024xf32>
    %136 = tpu.matmul %135, %134, %cst_61 {dimension_numbers = #tpu.dot_dimension_numbers<[1], [0], [0], [1], [0, 0, 1, 1], [], []>} : vector<32x32xbf16>, vector<32x1024xbf16>, vector<32x1024xf32> -> vector<32x1024xf32>
    %cst_62 = arith.constant 0.000000e+00 : f32
    %137 = vector.broadcast %cst_62 : f32 to vector<32x1024xf32>
    %138 = arith.maximumf %136, %137 : vector<32x1024xf32>
    %c0_63 = arith.constant 0 : index
    %c0_64 = arith.constant 0 : index
    %c0_65 = arith.constant 0 : index
    %139 = vector.load %arg6[%c0_63, %c0_64, %c0_65] : memref<2x32x32xbf16, #tpu.memory_space<vmem>>, vector<1x32x32xbf16>
    %140 = vector.shape_cast %139 : vector<1x32x32xbf16> to vector<32x32xbf16>
    %141 = arith.truncf %138 : vector<32x1024xf32> to vector<32x1024xbf16>
    %cst_66 = arith.constant dense<0.000000e+00> : vector<32x1024xf32>
    %142 = tpu.matmul %140, %141, %cst_66 {dimension_numbers = #tpu.dot_dimension_numbers<[1], [0], [0], [1], [0, 0, 1, 1], [], []>} : vector<32x32xbf16>, vector<32x1024xbf16>, vector<32x1024xf32> -> vector<32x1024xf32>
    %cst_67 = arith.constant 0.000000e+00 : f32
    %143 = vector.broadcast %cst_67 : f32 to vector<32x1024xf32>
    %144 = arith.maximumf %142, %143 : vector<32x1024xf32>
    %c1_68 = arith.constant 1 : index
    %c0_69 = arith.constant 0 : index
    %c0_70 = arith.constant 0 : index
    %145 = vector.load %arg6[%c1_68, %c0_69, %c0_70] : memref<2x32x32xbf16, #tpu.memory_space<vmem>>, vector<1x32x32xbf16>
    %146 = vector.shape_cast %145 : vector<1x32x32xbf16> to vector<32x32xbf16>
    %147 = arith.truncf %144 : vector<32x1024xf32> to vector<32x1024xbf16>
    %cst_71 = arith.constant dense<0.000000e+00> : vector<32x1024xf32>
    %148 = tpu.matmul %146, %147, %cst_71 {dimension_numbers = #tpu.dot_dimension_numbers<[1], [0], [0], [1], [0, 0, 1, 1], [], []>} : vector<32x32xbf16>, vector<32x1024xbf16>, vector<32x1024xf32> -> vector<32x1024xf32>
    %cst_72 = arith.constant 0.000000e+00 : f32
    %149 = vector.broadcast %cst_72 : f32 to vector<32x1024xf32>
    %150 = arith.maximumf %148, %149 : vector<32x1024xf32>
    %c0_73 = arith.constant 0 : index
    %c0_74 = arith.constant 0 : index
    %151 = vector.load %arg7[%c0_73, %c0_74] : memref<3x32xbf16, #tpu.memory_space<vmem>>, vector<3x32xbf16>
    %152 = arith.truncf %150 : vector<32x1024xf32> to vector<32x1024xbf16>
    %cst_75 = arith.constant dense<0.000000e+00> : vector<3x1024xf32>
    %153 = tpu.matmul %151, %152, %cst_75 {dimension_numbers = #tpu.dot_dimension_numbers<[1], [0], [0], [1], [0, 0, 1, 1], [], []>} : vector<3x32xbf16>, vector<32x1024xbf16>, vector<3x1024xf32> -> vector<3x1024xf32>
    %154 = arith.negf %153 : vector<3x1024xf32>
    %155 = math.exp %154 : vector<3x1024xf32>
    %cst_76 = arith.constant 1.000000e+00 : f32
    %156 = vector.broadcast %cst_76 : f32 to vector<3x1024xf32>
    %157 = arith.addf %156, %155 : vector<3x1024xf32>
    %158 = arith.divf %156, %157 : vector<3x1024xf32>
    %c0_77 = arith.constant 0 : index
    %c0_78 = arith.constant 0 : index
    %159 = vector.load %arg8[%c0_77, %c0_78] : memref<4x1024xf32, #tpu.memory_space<vmem>>, vector<3x1024xf32>
    tpu.vector_store %arg8[%c0_77, %c0_78], %158 {strides = array<i32>} : memref<4x1024xf32, #tpu.memory_space<vmem>>, vector<3x1024xf32>,
    %c3_79 = arith.constant 3 : index
    %c0_80 = arith.constant 0 : index
    %160 = vector.load %arg8[%c3_79, %c0_80] : memref<4x1024xf32, #tpu.memory_space<vmem>>, vector<1x1024xf32>
    tpu.vector_store %arg8[%c3_79, %c0_80], %11 {strides = array<i32>} : memref<4x1024xf32, #tpu.memory_space<vmem>>, vector<1x1024xf32>,
    return
  }
  func.func @transform_0(%arg0: i32) -> (i32, i32) {
    %c0_i32 = arith.constant 0 : i32
    %c0_i32_0 = arith.constant 0 : i32
    return %c0_i32, %arg0 : i32, i32
  }
  func.func @transform_1(%arg0: i32) -> (i32, i32) {
    %c0_i32 = arith.constant 0 : i32
    %c0_i32_0 = arith.constant 0 : i32
    return %c0_i32, %arg0 : i32, i32
  }
  func.func @transform_2(%arg0: i32) -> (i32, i32) {
    %c0_i32 = arith.constant 0 : i32
    %c0_i32_0 = arith.constant 0 : i32
    %c0_i32_1 = arith.constant 0 : i32
    return %c0_i32, %c0_i32_0 : i32, i32
  }
  func.func @transform_3(%arg0: i32) -> (i32, i32) {
    %c0_i32 = arith.constant 0 : i32
    %c0_i32_0 = arith.constant 0 : i32
    %c0_i32_1 = arith.constant 0 : i32
    return %c0_i32, %c0_i32_0 : i32, i32
  }
  func.func @transform_4(%arg0: i32) -> (i32, i32) {
    %c0_i32 = arith.constant 0 : i32
    %c0_i32_0 = arith.constant 0 : i32
    %c0_i32_1 = arith.constant 0 : i32
    return %c0_i32, %c0_i32_0 : i32, i32
  }
  func.func @transform_5(%arg0: i32) -> (i32, i32, i32) {
    %c0_i32 = arith.constant 0 : i32
    %c0_i32_0 = arith.constant 0 : i32
    %c0_i32_1 = arith.constant 0 : i32
    %c0_i32_2 = arith.constant 0 : i32
    return %c0_i32, %c0_i32_0, %c0_i32_1 : i32, i32, i32
  }
  func.func @transform_6(%arg0: i32) -> (i32, i32) {
    %c0_i32 = arith.constant 0 : i32
    %c0_i32_0 = arith.constant 0 : i32
    %c0_i32_1 = arith.constant 0 : i32
    return %c0_i32, %c0_i32_0 : i32, i32
  }
  func.func @transform_7(%arg0: i32) -> (i32, i32) {
    %c0_i32 = arith.constant 0 : i32
    %c0_i32_0 = arith.constant 0 : i32
    return %c0_i32, %arg0 : i32, i32
  }
}

</mosaic_0001>

<bundles_post_ra>
// kernel: ngp_forward.1
= control target key start
LH: loop header
LB: loop body
LE: loop exit
PB: predicated region body
PF: predicated region fallthrough
CT: control target
= control target key end

     0   :  { %s2405_s24 = smov 0   ;;  %s2407_s25 = smov 0   ;;  %s2736_s0 = inlined_call_operand.vmem [shape: bf16[32,3072], index: 0, kind: input, shape index: {}]   ;;  %s2737_s1 = inlined_call_operand.vmem [shape: f32[3,3072], index: 1, kind: input, shape index: {}]   ;;  %s2738_s2 = inlined_call_operand.vmem [shape: bf16[32,32], index: 2, kind: input, shape index: {}]   ;;  %s2739_s3 = inlined_call_operand.vmem [shape: bf16[16,32], index: 3, kind: input, shape index: {}]   ;;  %s2740_s4 = inlined_call_operand.vmem [shape: bf16[32,32], index: 4, kind: input, shape index: {}]   ;;  %s2741_s5 = inlined_call_operand.vmem [shape: bf16[2,32,32], index: 5, kind: input, shape index: {}]   ;;  %s2742_s6 = inlined_call_operand.vmem [shape: bf16[3,32], index: 6, kind: input, shape index: {}]   ;;  %s2743_s7 = inlined_call_operand.vmem [shape: f32[4,3072], index: 7, kind: output, shape index: {}]  }
   0x1   :  { %s2409_s26 = smov 0  }
   0x2 LB: > { %s2021_s27 = sadd.s32 4294967295, %s2362_s26   ;;  %s2422_s28 = sadd.s32 1, %s2362_s26   ;;  %s2362_s26 = sphi %s2409_s26, %s2756_s26   ;;  %s2358_s25 = sphi %s2407_s25, %s2755_s25   ;;  %s2354_s24 = sphi %s2405_s24, %s2754_s24  }
   0x3   : > { %s21_s29 = ssub.s32 %s2362_s26, %s2422_s28  ;;  %s24_s30 = sadd.s32 1, %s2358_s25 }
   0x4   : > { %p22_p0 = scmp.eq.s32.totalorder %s21_s29, 0  ;;  %p31_p1 = scmp.ne.s32.totalorder %s2358_s25, %s2354_s24 }
   0x5   : > { %p32_p2 = scmp.eq.s32.totalorder %s2362_s26, 0  ;;  %p2024_p4 = scmp.ge.s32.totalorder %s2362_s26, 3 }
   0x6   : > { %s2431_s8 = scalar_select %p22_p0, %s2358_s25, %s24_s30  }
   0x7   : > { %p33_p3 = por %p32_p2, %p31_p1  ;;  %229 = sbr.rel (%p2024_p4) target bundleno = 32 (0x20), region = 36 }
   0xc   : > { %232 = sbr.rel (!%p33_p3) target bundleno = 32 (0x20), region = 40  ;;  %s234_s9 = sand.u32 (%p33_p3), 1, %s2358_s25  }
   0xd   : > { %s2241_s10 = sshll.u32 (%p33_p3), %s2362_s26, 5  ;;  %s2025_s11 = sshll.u32 (%p33_p3), %s234_s9, 7 }
   0xe   : > { %s2439_s14 = scalar_lea.vmem (%p33_p3), %s2736_s0, %s2241_s10  ;;  %s236_s15 = scalar_lea.vmem (%p33_p3), [#allocation3], %s2025_s11 }
   0xf   : > { %v252_v0 = vld [vmem:[%s2439_s14] sm:$0xff] (%p33_p3)  ;;  %v254_v1 = vld [vmem:[%s2439_s14 + $0x8] sm:$0xff] (%p33_p3)  ;;  %v256_v2 = vld [vmem:[%s2439_s14 + $0x10] sm:$0xff] (%p33_p3) }
  0x10   : > { %253 = vst [vmem:[%s236_s15] sm:$0xff] (%p33_p3), %v252_v0  ;;  %v258_v3 = vld [vmem:[%s2439_s14 + $0x18] sm:$0xff] (%p33_p3)  ;;  %v260_v4 = vld [vmem:[%s2439_s14 + $0x60] sm:$0xff] (%p33_p3)  ;;  %v262_v5 = vld [vmem:[%s2439_s14 + $0x68] sm:$0xff] (%p33_p3) }
  0x11   : > { %255 = vst [vmem:[%s236_s15 + $0x8] sm:$0xff] %v254_v1  ;;  %v264_v6 = vld [vmem:[%s2439_s14 + $0x70] sm:$0xff]  ;;  %v266_v7 = vld [vmem:[%s2439_s14 + $0x78] sm:$0xff]  ;;  %v268_v8 = vld [vmem:[%s2439_s14 + $0xc0] sm:$0xff] }
  0x12   : > { %257 = vst [vmem:[%s236_s15 + $0x10] sm:$0xff] %v256_v2  ;;  %v270_v9 = vld [vmem:[%s2439_s14 + $0xc8] sm:$0xff]  ;;  %v272_v10 = vld [vmem:[%s2439_s14 + $0xd0] sm:$0xff]  ;;  %v274_v11 = vld [vmem:[%s2439_s14 + $0xd8] sm:$0xff] }
  0x13   : > { %259 = vst [vmem:[%s236_s15 + $0x18] sm:$0xff] %v258_v3  ;;  %v276_v12 = vld [vmem:[%s2439_s14 + $0x120] sm:$0xff]  ;;  %v278_v13 = vld [vmem:[%s2439_s14 + $0x128] sm:$0xff]  ;;  %v280_v14 = vld [vmem:[%s2439_s14 + $0x130] sm:$0xff] }
  0x14   : > { %261 = vst [vmem:[%s236_s15 + $0x20] sm:$0xff] %v260_v4  ;;  %v282_v15 = vld [vmem:[%s2439_s14 + $0x138] sm:$0xff] }
  0x15   : > { %263 = vst [vmem:[%s236_s15 + $0x28] sm:$0xff] %v262_v5 }
  0x16   : > { %265 = vst [vmem:[%s236_s15 + $0x30] sm:$0xff] %v264_v6 }
  0x17   : > { %267 = vst [vmem:[%s236_s15 + $0x38] sm:$0xff] %v266_v7 }
  0x18   : > { %269 = vst [vmem:[%s236_s15 + $0x40] sm:$0xff] %v268_v8 }
  0x19   : > { %271 = vst [vmem:[%s236_s15 + $0x48] sm:$0xff] %v270_v9 }
  0x1a   : > { %273 = vst [vmem:[%s236_s15 + $0x50] sm:$0xff] %v272_v10 }
  0x1b   : > { %275 = vst [vmem:[%s236_s15 + $0x58] sm:$0xff] %v274_v11 }
  0x1c   : > { %277 = vst [vmem:[%s236_s15 + $0x60] sm:$0xff] %v276_v12 }
  0x1d   : > { %279 = vst [vmem:[%s236_s15 + $0x68] sm:$0xff] %v278_v13 }
  0x1e   : > { %281 = vst [vmem:[%s236_s15 + $0x70] sm:$0xff] %v280_v14 }
  0x1f   : > { %283 = vst [vmem:[%s236_s15 + $0x78] sm:$0xff] %v282_v15 }
  0x20 PF: > { %p2028_p5 = scmp.ge.s32.totalorder %s2362_s26, 1  ;;  %p297_p6 = scmp.lt.s32.totalorder %s2362_s26, 4 }
  0x22   : > { %p298_p7 = pnand %p2028_p5, %p297_p6 }
  0x23   : > { %s304_s16 = sand.u32 (!%p298_p7), 1, %s2354_s24   ;;  %s2030_s29 = sshll.u32 (!%p298_p7), %s2021_s27, 3 }
  0x24   : > { %301 = sbr.rel (%p298_p7) target bundleno = 1066 (0x42a), region = 67  ;;  %s2029_s17 = sshll.u32 (!%p298_p7), %s304_s16, 7 }
  0x25   : > { %s2460_s18 = scalar_lea.vmem (!%p298_p7), [#allocation3], %s2029_s17  ;;  %p342_p8 = scmp.lt.s32.totalorder (!%p298_p7), %s2030_s29, 23 }
  0x29   : > { %vm464_vm0 = vcmask 261120   ;;  %v2084_v16 = vld [vmem:[%s2460_s18 + $0x48] sm:$0xf]  ;;  %v2251_v18 = vld [vmem:[%s2460_s18 + $0x4c] sm:$0xf]  ;;  %v2258_v32 = vld [vmem:[%s2738_s2] sm:$0xff] }
  0x2a   : > { %v2255_v17 = vld [vmem:[%s2460_s18 + $0x64] sm:$0xf0]  ;;  %v2086_v20 = vld [vmem:[%s2460_s18 + $0x68] sm:$0xf0]  ;;  %v2250_v26 = vld [vmem:[%s2460_s18 + $0x44] sm:$0xf] }
  0x2b   : > { %v2085_v19 = vor.u32 %v2255_v17, %v2084_v16  ;;  %v2052_v21 = vld [vmem:[%s2460_s18 + $0x8] sm:$0xf]  ;;  %v2089_v23 = vor.u32 %v2251_v18, %v2086_v20  ;;  %v2243_v24 = vld [vmem:[%s2460_s18 + $0xc] sm:$0xf]  ;;  %v2078_v28 = vld [vmem:[%s2460_s18 + $0x60] sm:$0xf0] }
  0x2c   : > { %v2247_v22 = vld [vmem:[%s2460_s18 + $0x24] sm:$0xf0]  ;;  %v2054_v25 = vld [vmem:[%s2460_s18 + $0x28] sm:$0xf0]  ;;  %v2076_v29 = vld [vmem:[%s2460_s18 + $0x40] sm:$0xf]  ;;  %v2081_v33 = vor.u32 %v2250_v26, %v2078_v28 }
  0x2d   : > { %515 = vmatpush.bf16.msra.mxu2 %v2085_v19  ;;  %v2053_v27 = vor.u32 %v2247_v22, %v2052_v21  ;;  %v2254_v30 = vld [vmem:[%s2460_s18 + $0x5c] sm:$0xf0]  ;;  %534 = vmatpush.bf16.msra.mxu3 %v2089_v23  ;;  %v2057_v31 = vor.u32 %v2243_v24, %v2054_v25  ;;  %v2242_v35 = vld [vmem:[%s2460_s18 + $0x4] sm:$0xf]  ;;  %v2100_v39 = vld [vmem:[%s2460_s18 + $0x58] sm:$0xf] }
  0x2e   : > { %v2077_v34 = vor.u32 %v2254_v30, %v2076_v29  ;;  %v2046_v36 = vld [vmem:[%s2460_s18 + $0x20] sm:$0xf0]  ;;  %v2044_v37 = vld [vmem:[%s2460_s18] sm:$0xf]  ;;  %v2257_v40 = vld [vmem:[%s2460_s18 + $0x74] sm:$0xf0]  ;;  %496 = vmatpush.bf16.msra.mxu1 %v2081_v33 }
  0x2f   : > { %v2246_v38 = vld [vmem:[%s2460_s18 + $0x1c] sm:$0xf0]  ;;  %v2049_v41 = vor.u32 %v2242_v35, %v2046_v36  ;;  %v2101_v42 = vor.u32 %v2257_v40, %v2100_v39  ;;  %v2253_v43 = vld [vmem:[%s2460_s18 + $0x5c] sm:$0xf]  ;;  %v2068_v45 = vld [vmem:[%s2460_s18 + $0x18] sm:$0xf] }
  0x30   : > { %477 = vmatpush.bf16.msra.mxu0 %v2077_v34  ;;  %v2102_v44 = vld [vmem:[%s2460_s18 + $0x78] sm:$0xf0]  ;;  %v2045_v46 = vor.u32 %v2246_v38, %v2044_v37  ;;  %v2249_v48 = vld [vmem:[%s2460_s18 + $0x34] sm:$0xf0]  ;;  %v2252_v53 = vld [vmem:[%s2460_s18 + $0x54] sm:$0xf] }
  0x31   : > { %516 = vmatpush.bf16.msra.mxu2 %v2053_v27  ;;  %v2105_v47 = vor.u32 %v2253_v43, %v2102_v44  ;;  %v2245_v49 = vld [vmem:[%s2460_s18 + $0x1c] sm:$0xf]  ;;  %535 = vmatpush.bf16.msra.mxu3 %v2057_v31  ;;  %v2069_v51 = vor.u32 %v2249_v48, %v2068_v45  ;;  %v2094_v54 = vld [vmem:[%s2460_s18 + $0x70] sm:$0xf0]  ;;  %v2092_v56 = vld [vmem:[%s2460_s18 + $0x50] sm:$0xf] }
  0x32   : > { %v2070_v50 = vld [vmem:[%s2460_s18 + $0x38] sm:$0xf0]  ;;  %497 = vmatpush.bf16.msra.mxu1 %v2049_v41  ;;  %v2097_v55 = vor.u32 %v2252_v53, %v2094_v54  ;;  %v2256_v57 = vld [vmem:[%s2460_s18 + $0x6c] sm:$0xf0]  ;;  %v2244_v58 = vld [vmem:[%s2460_s18 + $0x14] sm:$0xf] }
  0x33   : > { %v2073_v52 = vor.u32 %v2245_v49, %v2070_v50  ;;  %v2093_v59 = vor.u32 %v2256_v57, %v2092_v56  ;;  %v2062_v60 = vld [vmem:[%s2460_s18 + $0x30] sm:$0xf0]  ;;  %v2060_v61 = vld [vmem:[%s2460_s18 + $0x10] sm:$0xf]  ;;  %v2259_v1 = vld [vmem:[%s2738_s2 + $0x8] sm:$0xff]  ;;  %s2758_s29 = smov (!%p342_p8, %s2030_s29), 23 }
  0x34   : > { %2110 = vmatmul.msk.bf16.vlgmr.msra.gmra.mxu2 %vm464_vm0, %v2258_v32  ;;  %2112 = vmatmul.msk.bf16.vlgmr.msra.gmra.mxu3 %vm464_vm0, %v2258_v32  ;;  %v2248_v62 = vld [vmem:[%s2460_s18 + $0x2c] sm:$0xf0]  ;;  %v2065_v63 = vor.u32 %v2244_v58, %v2062_v60  ;;  %v2260_v43 = vld [vmem:[%s2739_s3] sm:$0xff]  ;;  %s2031_s30 = sshll.u32 %s2758_s29, 2  ;;  %vm1931_vm1 = vcmask 1040384   ;;  %vm1933_vm2 = vcmask 1042434  }
  0x35   : > { %591 = vmatpush.bf16.msrb.mxu2 %v2101_v42  ;;  %610 = vmatpush.bf16.msrb.mxu3 %v2105_v47  ;;  %v2061_v0 = vor.u32 %v2248_v62, %v2060_v61  ;;  %s345_s11 = scalar_lea.vmem %s2737_s1, %s2031_s30  ;;  %vm1937_vm3 = vcmask 1044484   ;;  %vm1935_vm4 = vcmask 1041408   ;;  %vm1939_vm5 = vcmask 1046534   ;;  %s2573_s16 = scalar_lea.vmem %s2743_s7, %s2031_s30 }
  0x36   : > { %478 = vmatpush.bf16.msra.mxu0 %v2045_v46  ;;  %572 = vmatpush.bf16.msrb.mxu1 %v2097_v55  ;;  %vm1941_vm6 = vcmask 1045508   ;;  %vm1903_vm7 = vcmask 1043456  }
  0x37   : > { %2108 = vmatmul.msk.bf16.vlgmr.msra.gmra.mxu1 %vm464_vm0, %v2258_v32 }
  0x39   : > { %592 = vmatpush.bf16.msrb.mxu2 %v2069_v51  ;;  %611 = vmatpush.bf16.msrb.mxu3 %v2073_v52 }
  0x3a   : > { %2106 = vmatmul.msk.bf16.vlgmr.msra.gmra.mxu0 %vm464_vm0, %v2258_v32  ;;  %573 = vmatpush.bf16.msrb.mxu1 %v2065_v63 }
  0x3b   : > { %553 = vmatpush.bf16.msrb.mxu0 %v2093_v59 }
  0x3f   : > { %554 = vmatpush.bf16.msrb.mxu0 %v2061_v0 }
  0x44   : > { %2111 = vmatmul.msk.bf16.gmra.mxu2 %vm464_vm0, %v2259_v1  ;;  %2113 = vmatmul.msk.bf16.gmra.mxu3 %vm464_vm0, %v2259_v1 }
  0x47   : > { %2109 = vmatmul.msk.bf16.gmra.mxu1 %vm464_vm0, %v2259_v1 }
  0x4a   : > { %2107 = vmatmul.msk.bf16.gmra.mxu0 %vm464_vm0, %v2259_v1 }
  0x54   : > { %2118 = vmatmul.msk.bf16.vlgmr.msrb.gmra.mxu2 %vm464_vm0, %v2258_v32  ;;  %2120 = vmatmul.msk.bf16.vlgmr.msrb.gmra.mxu3 %vm464_vm0, %v2258_v32 }
  0x57   : > { %2116 = vmatmul.msk.bf16.vlgmr.msrb.gmra.mxu1 %vm464_vm0, %v2258_v32 }
  0x5a   : > { %2114 = vmatmul.msk.bf16.vlgmr.msrb.gmra.mxu0 %vm464_vm0, %v2258_v32 }
  0x64   : > { %2119 = vmatmul.msk.bf16.gmra.mxu2 %vm464_vm0, %v2259_v1  ;;  %2121 = vmatmul.msk.bf16.gmra.mxu3 %vm464_vm0, %v2259_v1 }
  0x67   : > { %2117 = vmatmul.msk.bf16.gmra.mxu1 %vm464_vm0, %v2259_v1 }
  0x6a   : > { %2115 = vmatmul.msk.bf16.gmra.mxu0 %vm464_vm0, %v2259_v1 }
  0xb4   : > { %v499_v2 = vpop.f32.mrf.mxu1 }
  0xb5   : > { %v624_v17 = vmax.f32 %v499_v2, 0.0 }
  0xb7   : > { %v480_v3 = vpop.f32.mrf.mxu0  ;;  %v518_v4 = vpop.f32.mrf.mxu2 }
  0xb8   : > { %v537_v5 = vpop.f32.mrf.mxu3  ;;  %v623_v21 = vmax.f32 %v480_v3, 0.0  ;;  %v625_v38 = vmax.f32 %v518_v4, 0.0 }
  0xb9   : > { %v626_v40 = vmax.f32 %v537_v5, 0.0 }
  0xbc   : > { %v501_v6 = vpop.f32.mrf.mxu1 }
  0xbd   : > { %v632_v18 = vmax.f32 %v501_v6, 0.0 }
  0xbf   : > { %v482_v7 = vpop.f32.mrf.mxu0  ;;  %v520_v8 = vpop.f32.mrf.mxu2  ;;  %v658_v30 = vpack.c.bf16 %v632_v18, %v624_v17 }
  0xc0   : > { %v539_v9 = vpop.f32.mrf.mxu3  ;;  %v631_v22 = vmax.f32 %v482_v7, 0.0  ;;  %v633_v33 = vmax.f32 %v520_v8, 0.0 }
  0xc1   : > { %v634_v36 = vmax.f32 %v539_v9, 0.0 }
  0xc2   : > { %v657_v34 = vpack.c.bf16 %v631_v22, %v623_v21  ;;  %v659_v42 = vpack.c.bf16 %v633_v33, %v625_v38 }
  0xc3   : > { %v660_v44 = vpack.c.bf16 %v634_v36, %v626_v40  ;;  %v2364_v40 = vmov 0.2820948  }
  0xc4   : > { %v504_v10 = vpop.f32.mrf.mxu1  ;;  %859 = vst [vmem:[#allocation2] ss:$8 sm:$0xf] %v2364_v40 }
  0xc5   : > { %v640_v14 = vmax.f32 %v504_v10, 0.0  ;;  %860 = vst [vmem:[#allocation2] ss:$8 sm:$0xf0] %v2364_v40 }
  0xc7   : > { %v485_v11 = vpop.f32.mrf.mxu0  ;;  %v523_v12 = vpop.f32.mrf.mxu2 }
  0xc8   : > { %v542_v13 = vpop.f32.mrf.mxu3  ;;  %v639_v15 = vmax.f32 %v485_v11, 0.0  ;;  %v641_v26 = vmax.f32 %v523_v12, 0.0 }
  0xc9   : > { %v642_v31 = vmax.f32 %v542_v13, 0.0 }
  0xcc   : > { %v506_v16 = vpop.f32.mrf.mxu1 }
  0xcd   : > { %v648_v19 = vmax.f32 %v506_v16, 0.0 }
  0xcf   : > { %v487_v20 = vpop.f32.mrf.mxu0  ;;  %v525_v24 = vpop.f32.mrf.mxu2  ;;  %v666_v25 = vpack.c.bf16 %v648_v19, %v640_v14  ;;  %v817_v19 = vld [vmem:[%s345_s11] ss:$4 sm:$0xff] }
  0xd0   : > { %v647_v23 = vmax.f32 %v487_v20, 0.0  ;;  %v649_v27 = vmax.f32 %v525_v24, 0.0  ;;  %v544_v28 = vpop.f32.mrf.mxu3  ;;  %v2143_v20 = vld [vmem:[%s345_s11 + $0x2] ss:$4 sm:$0xff]  ;;  %v825_v21 = vmul.f32 %v817_v19, %v817_v19  ;;  %v830_v36 = vmul.f32 -0.48860252, %v817_v19 }
  0xd1   : > { %v650_v32 = vmax.f32 %v544_v28, 0.0  ;;  %701 = vmatpush.bf16.msra.mxu1 %v666_v25  ;;  %v827_v22 = vmul.f32 %v2143_v20, %v2143_v20  ;;  %v829_v33 = vmul.f32 0.48860252, %v2143_v20 }
  0xd2   : > { %v665_v29 = vpack.c.bf16 %v647_v23, %v639_v15  ;;  %v667_v35 = vpack.c.bf16 %v649_v27, %v641_v26  ;;  %v2142_v23 = vld [vmem:[%s345_s11 + $0x1] ss:$4 sm:$0xff]  ;;  %v839_v26 = vmul.f32 -3.0, %v825_v21  ;;  %868 = vst [vmem:[#allocation2 + $0x3] ss:$8 sm:$0xf] %v830_v36 }
  0xd3   : > { %v668_v37 = vpack.c.bf16 %v650_v32, %v642_v31  ;;  %v822_v24 = vmul.f32 %v2142_v23, %v817_v19  ;;  %v823_v25 = vmul.f32 %v2143_v20, %v2142_v23  ;;  %v845_v27 = vmul.f32 5.0, %v827_v22  ;;  %865 = vst [vmem:[#allocation2 + $0x2] ss:$8 sm:$0xf] %v829_v33 }
  0xd4   : > { %687 = vmatpush.bf16.msra.mxu0 %v665_v29  ;;  %715 = vmatpush.bf16.msra.mxu2 %v667_v35  ;;  %v575_v39 = vpop.f32.mrf.mxu1  ;;  %v826_v28 = vmul.f32 %v2142_v23, %v2142_v23  ;;  %v828_v29 = vmul.f32 -0.48860252, %v2142_v23  ;;  %v838_v31 = vmul.f32 0.5900436, %v2142_v23  ;;  %v824_v32 = vmul.f32 %v2143_v20, %v817_v19 }
  0xd5   : > { %729 = vmatpush.bf16.msra.mxu3 %v668_v37  ;;  %702 = vmatpush.bf16.msra.mxu1 %v658_v30  ;;  %v628_v58 = vmax.f32 %v575_v39, 0.0  ;;  %v833_v30 = vmul.f32 0.9461747, %v827_v22  ;;  %v844_v35 = vmul.f32 0.4570458, %v2142_v23  ;;  %v2553_v23 = vld [vmem:[%s2740_s4 + $0x8] sm:$0xff] }
  0xd6   : > { %v831_v37 = vmul.f32 1.0925485, %v822_v24  ;;  %v836_v38 = vsub.f32 %v825_v21, %v826_v28  ;;  %v832_v39 = vmul.f32 -1.0925485, %v823_v25 }
  0xd7   : > { %v556_v41 = vpop.f32.mrf.mxu0  ;;  %v594_v45 = vpop.f32.mrf.mxu2  ;;  %862 = vst [vmem:[#allocation2 + $0x1] ss:$8 sm:$0xf] %v828_v29 }
  0xd8   : > { %688 = vmatpush.bf16.msra.mxu0 %v657_v34  ;;  %v613_v46 = vpop.f32.mrf.mxu3  ;;  %716 = vmatpush.bf16.msra.mxu2 %v659_v42  ;;  %v627_v62 = vmax.f32 %v556_v41, 0.0  ;;  %v629_v15 = vmax.f32 %v594_v45, 0.0  ;;  %v842_v34 = vmul.f32 2.8906114, %v822_v24  ;;  %v2144_v41 = vadd.f32 -0.31539157, %v833_v30 }
  0xd9   : > { %2127 = vmatmul.msk.bf16.vlgmr.msra.gmra.mxu1 %vm464_vm0, %v2260_v43  ;;  %730 = vmatpush.bf16.msra.mxu3 %v660_v44  ;;  %v630_v16 = vmax.f32 %v613_v46, 0.0  ;;  %v840_v42 = vadd.f32 %v839_v26, %v826_v28  ;;  %v856_v44 = vmul.f32 3.0, %v826_v28  ;;  %v837_v45 = vmul.f32 0.54627424, %v836_v38 }
  0xda   : > { %v846_v46 = vsub.f32 1.0, %v845_v27  ;;  %871 = vst [vmem:[#allocation2 + $0x4] ss:$8 sm:$0xf] %v831_v37 }
  0xdb   : > { %2126 = vmatmul.msk.bf16.vlgmr.msra.gmra.mxu0 %vm464_vm0, %v2260_v43  ;;  %2128 = vmatmul.msk.bf16.vlgmr.msra.gmra.mxu2 %vm464_vm0, %v2260_v43  ;;  %874 = vst [vmem:[#allocation2 + $0x5] ss:$8 sm:$0xf] %v832_v39 }
  0xdc   : > { %2129 = vmatmul.msk.bf16.vlgmr.msra.gmra.mxu3 %vm464_vm0, %v2260_v43  ;;  %v577_v47 = vpop.f32.mrf.mxu1  ;;  %877 = vst [vmem:[#allocation2 + $0x6] ss:$8 sm:$0xf] %v2144_v41 }
  0xdd   : > { %v636_v59 = vmax.f32 %v577_v47, 0.0  ;;  %v848_v47 = vmul.f32 0.37317634, %v2143_v20  ;;  %883 = vst [vmem:[#allocation2 + $0x40] ss:$8 sm:$0xf] %v837_v45 }
  0xde   : > { %863 = vst [vmem:[#allocation2 + $0x1] ss:$8 sm:$0xf0] %v828_v29 }
  0xdf   : > { %v558_v48 = vpop.f32.mrf.mxu0  ;;  %v596_v49 = vpop.f32.mrf.mxu2  ;;  %v662_v7 = vpack.c.bf16 %v636_v59, %v628_v58  ;;  %866 = vst [vmem:[#allocation2 + $0x2] ss:$8 sm:$0xf0] %v829_v33 }
  0xe0   : > { %v615_v50 = vpop.f32.mrf.mxu3  ;;  %v635_v63 = vmax.f32 %v558_v48, 0.0  ;;  %v637_v10 = vmax.f32 %v596_v49, 0.0  ;;  %v2145_v48 = vadd.f32 -3.0, %v845_v27  ;;  %v841_v49 = vmul.f32 %v840_v42, %v838_v31  ;;  %869 = vst [vmem:[#allocation2 + $0x3] ss:$8 sm:$0xf0] %v830_v36 }
  0xe1   : > { %v638_v13 = vmax.f32 %v615_v50, 0.0  ;;  %v851_v50 = vmul.f32 0.4570458, %v817_v19  ;;  %872 = vst [vmem:[#allocation2 + $0x4] ss:$8 sm:$0xf0] %v831_v37 }
  0xe2   : > { %v661_v11 = vpack.c.bf16 %v635_v63, %v627_v62  ;;  %v663_v17 = vpack.c.bf16 %v637_v10, %v629_v15  ;;  %886 = vst [vmem:[#allocation2 + $0x41] ss:$8 sm:$0xf] %v841_v49  ;;  %v2540_v10 = vld [vmem:[%s2740_s4] sm:$0xff] }
  0xe3   : > { %v664_v18 = vpack.c.bf16 %v638_v13, %v630_v16  ;;  %875 = vst [vmem:[#allocation2 + $0x5] ss:$8 sm:$0xf0] %v832_v39 }
  0xe4   : > { %v580_v51 = vpop.f32.mrf.mxu1  ;;  %878 = vst [vmem:[#allocation2 + $0x6] ss:$8 sm:$0xf0] %v2144_v41 }
  0xe5   : > { %v644_v55 = vmax.f32 %v580_v51, 0.0  ;;  %v843_v51 = vmul.f32 %v2143_v20, %v842_v34  ;;  %884 = vst [vmem:[#allocation2 + $0x40] ss:$8 sm:$0xf0] %v837_v45 }
  0xe6   : > { %887 = vst [vmem:[#allocation2 + $0x41] ss:$8 sm:$0xf0] %v841_v49 }
  0xe7   : > { %v561_v52 = vpop.f32.mrf.mxu0  ;;  %v599_v53 = vpop.f32.mrf.mxu2  ;;  %889 = vst [vmem:[#allocation2 + $0x42] ss:$8 sm:$0xf] %v843_v51 }
  0xe8   : > { %v618_v54 = vpop.f32.mrf.mxu3  ;;  %v643_v56 = vmax.f32 %v561_v52, 0.0  ;;  %v645_v3 = vmax.f32 %v599_v53, 0.0  ;;  %v853_v52 = vmul.f32 1.4453057, %v2143_v20  ;;  %v847_v53 = vmul.f32 %v846_v46, %v844_v35 }
  0xe9   : > { %v646_v8 = vmax.f32 %v618_v54, 0.0  ;;  %v855_v54 = vmul.f32 0.5900436, %v817_v19  ;;  %890 = vst [vmem:[#allocation2 + $0x42] ss:$8 sm:$0xf0] %v843_v51 }
  0xea   : > { %v854_v58 = vmul.f32 %v853_v52, %v836_v38  ;;  %892 = vst [vmem:[#allocation2 + $0x43] ss:$8 sm:$0xf] %v847_v53 }
  0xeb   : > { %893 = vst [vmem:[#allocation2 + $0x43] ss:$8 sm:$0xf0] %v847_v53 }
  0xec   : > { %v582_v57 = vpop.f32.mrf.mxu1  ;;  %901 = vst [vmem:[#allocation2 + $0x46] ss:$8 sm:$0xf] %v854_v58 }
  0xed   : > { %v652_v60 = vmax.f32 %v582_v57, 0.0  ;;  %v852_v57 = vmul.f32 %v851_v50, %v846_v46  ;;  %902 = vst [vmem:[#allocation2 + $0x46] ss:$8 sm:$0xf0] %v854_v58 }
  0xef   : > { %v563_v61 = vpop.f32.mrf.mxu0  ;;  %v601_v1 = vpop.f32.mrf.mxu2  ;;  %v670_v2 = vpack.c.bf16 %v652_v60, %v644_v55  ;;  %v857_v55 = vsub.f32 %v856_v44, %v825_v21  ;;  %898 = vst [vmem:[#allocation2 + $0x45] ss:$8 sm:$0xf] %v852_v57 }
  0xf0   : > { %v651_v0 = vmax.f32 %v563_v61, 0.0  ;;  %v653_v4 = vmax.f32 %v601_v1, 0.0  ;;  %v620_v5 = vpop.f32.mrf.mxu3  ;;  %899 = vst [vmem:[#allocation2 + $0x45] ss:$8 sm:$0xf0] %v852_v57 }
  0xf1   : > { %v654_v9 = vmax.f32 %v620_v5, 0.0  ;;  %757 = vmatpush.bf16.msrb.mxu1 %v670_v2  ;;  %v858_v59 = vmul.f32 %v857_v55, %v855_v54 }
  0xf2   : > { %v669_v6 = vpack.c.bf16 %v651_v0, %v643_v56  ;;  %v671_v12 = vpack.c.bf16 %v653_v4, %v645_v3  ;;  %v850_v56 = vmul.f32 %v2145_v48, %v848_v47 }
  0xf3   : > { %v672_v14 = vpack.c.bf16 %v654_v9, %v646_v8  ;;  %904 = vst [vmem:[#allocation2 + $0x47] ss:$8 sm:$0xf] %v858_v59 }
  0xf4   : > { %743 = vmatpush.bf16.msrb.mxu0 %v669_v6  ;;  %771 = vmatpush.bf16.msrb.mxu2 %v671_v12  ;;  %895 = vst [vmem:[#allocation2 + $0x44] ss:$8 sm:$0xf] %v850_v56 }
  0xf5   : > { %785 = vmatpush.bf16.msrb.mxu3 %v672_v14  ;;  %758 = vmatpush.bf16.msrb.mxu1 %v662_v7  ;;  %896 = vst [vmem:[#allocation2 + $0x44] ss:$8 sm:$0xf0] %v850_v56 }
  0xf6   : > { %905 = vst [vmem:[#allocation2 + $0x47] ss:$8 sm:$0xf0] %v858_v59 }
  0xf8   : > { %744 = vmatpush.bf16.msrb.mxu0 %v661_v11  ;;  %772 = vmatpush.bf16.msrb.mxu2 %v663_v17 }
  0xf9   : > { %2131 = vmatmul.msk.bf16.vlgmr.msrb.gmra.mxu1 %vm464_vm0, %v2260_v43  ;;  %786 = vmatpush.bf16.msrb.mxu3 %v664_v18 }
  0xfb   : > { %2130 = vmatmul.msk.bf16.vlgmr.msrb.gmra.mxu0 %vm464_vm0, %v2260_v43  ;;  %2132 = vmatmul.msk.bf16.vlgmr.msrb.gmra.mxu2 %vm464_vm0, %v2260_v43  ;;  %v931_v0 = vld [vmem:[#allocation2 + $0x48] sm:$0xff]  ;;  %v930_v5 = vld [vmem:[#allocation2 + $0x40] sm:$0xff]  ;;  %v932_v13 = vld [vmem:[#allocation2 + $0x50] sm:$0xff] }
  0xfc   : > { %2133 = vmatmul.msk.bf16.vlgmr.msrb.gmra.mxu3 %vm464_vm0, %v2260_v43  ;;  %v835_v43 = vmul.f32 -1.0925485, %v824_v32  ;;  %v933_v17 = vld [vmem:[#allocation2 + $0x58] sm:$0xff] }
  0xfd   : > { %v935_v38 = vld [vmem:[#allocation2 + $0x68] sm:$0xff] }
  0xfe   : > { %880 = vst [vmem:[#allocation2 + $0x7] ss:$8 sm:$0xf] %v835_v43 }
  0xff   : > { %881 = vst [vmem:[#allocation2 + $0x7] ss:$8 sm:$0xf0] %v835_v43  ;;  %v934_v43 = vld [vmem:[#allocation2 + $0x60] sm:$0xff] }
 0x105   : > { %v923_v63 = vld [vmem:[#allocation2 + $0x8] sm:$0xff]  ;;  %v922_v4 = vld [vmem:[#allocation2] sm:$0xff]  ;;  %v924_v12 = vld [vmem:[#allocation2 + $0x10] sm:$0xff] }
 0x106   : > { %v955_v8 = vpack.c.bf16 %v931_v0, %v923_v63  ;;  %v954_v9 = vpack.c.bf16 %v930_v5, %v922_v4  ;;  %v925_v16 = vld [vmem:[#allocation2 + $0x18] sm:$0xff]  ;;  %v956_v19 = vpack.c.bf16 %v932_v13, %v924_v12  ;;  %v927_v37 = vld [vmem:[#allocation2 + $0x28] sm:$0xff]  ;;  %v926_v42 = vld [vmem:[#allocation2 + $0x20] sm:$0xff] }
 0x107   : > { %v957_v20 = vpack.c.bf16 %v933_v17, %v925_v16  ;;  %v959_v49 = vpack.c.bf16 %v935_v38, %v927_v37  ;;  %v958_v52 = vpack.c.bf16 %v934_v43, %v926_v42  ;;  %v929_v4 = vld [vmem:[#allocation2 + $0x38] sm:$0xff] }
 0x108   : > { %v937_v5 = vld [vmem:[#allocation2 + $0x78] sm:$0xff] }
 0x109   : > { %v961_v13 = vpack.c.bf16 %v937_v5, %v929_v4  ;;  %v2264_v4 = vld [vmem:[%s2741_s5 + $0x8] sm:$0xff] }
 0x156   : > { %v704_v60 = vpop.f32.mrf.mxu1 }
 0x157   : > { %v2135_v21 = vadd.f32 -1.0, %v704_v60 }
 0x158   : > { %v690_v61 = vpop.f32.mrf.mxu0 }
 0x159   : > { %v803_v26 = vmul.f32 1.442695, %v2135_v21  ;;  %v2134_v32 = vadd.f32 -1.0, %v690_v61 }
 0x15b   : > { %2292 = vpow2.f32 %v803_v26  ;;  %v801_v35 = vmul.f32 1.442695, %v2134_v32 }
 0x15e   : > { %v706_v62 = vpop.f32.mrf.mxu1  ;;  %v718_v1 = vpop.f32.mrf.mxu2 }
 0x15f   : > { %v963_v3 = vpack.c.bf16 %v706_v62, %v704_v60  ;;  %v732_v6 = vpop.f32.mrf.mxu3  ;;  %v2136_v22 = vadd.f32 -1.0, %v718_v1  ;;  %v928_v60 = vld [vmem:[#allocation2 + $0x30] sm:$0xff] }
 0x160   : > { %v692_v2 = vpop.f32.mrf.mxu0  ;;  %v2137_v24 = vadd.f32 -1.0, %v732_v6 }
 0x161   : > { %v962_v7 = vpack.c.bf16 %v692_v2, %v690_v61  ;;  %1015 = vmatpush.bf16.msra.mxu1 %v963_v3  ;;  %v805_v29 = vmul.f32 1.442695, %v2136_v22  ;;  %v2293_v47 = vpop.eup %2292  ;;  %v936_v61 = vld [vmem:[#allocation2 + $0x70] sm:$0xff] }
 0x162   : > { %v807_v31 = vmul.f32 1.442695, %v2137_v24  ;;  %v1924_v57 = vrot.slane %v2293_v47, 7  ;;  %v2593_v47 = vld [vmem:[%s2741_s5] sm:$0xff] }
 0x163   : > { %996 = vmatpush.bf16.msra.mxu0 %v962_v7  ;;  %2294 = vpow2.f32 %v805_v29 }
 0x164   : > { %2296 = vpow2.f32 %v807_v31 }
 0x165   : > { %1016 = vmatpush.bf16.msra.mxu1 %v955_v8  ;;  %v960_v8 = vpack.c.bf16 %v936_v61, %v928_v60 }
 0x166   : > { %v720_v11 = vpop.f32.mrf.mxu2 }
 0x167   : > { %997 = vmatpush.bf16.msra.mxu0 %v954_v9  ;;  %v734_v14 = vpop.f32.mrf.mxu3  ;;  %v964_v15 = vpack.c.bf16 %v720_v11, %v718_v1 }
 0x168   : > { %2156 = vmatmul.msk.bf16.vlgmr.msra.gmra.mxu1 %vm464_vm0, %v2540_v10  ;;  %v965_v18 = vpack.c.bf16 %v734_v14, %v732_v6 }
 0x169   : > { %1034 = vmatpush.bf16.msra.mxu2 %v964_v15  ;;  %v2295_v50 = vpop.eup %2294 }
 0x16a   : > { %2154 = vmatmul.msk.bf16.vlgmr.msra.gmra.mxu0 %vm464_vm0, %v2540_v10  ;;  %1053 = vmatpush.bf16.msra.mxu3 %v965_v18  ;;  %v2297_v53 = vpop.eup %2296  ;;  %v1925_v58 = vrot.slane %v2295_v50, 6 }
 0x16b   : > { %v1926_v63 = vrot.slane %v2297_v53, 5 }
 0x16d   : > { %1035 = vmatpush.bf16.msra.mxu2 %v956_v19  ;;  %v1934_v14 = vsel %vm1933_vm2, %v1925_v58, %v1926_v63 }
 0x16e   : > { %1054 = vmatpush.bf16.msra.mxu3 %v957_v20 }
 0x170   : > { %2158 = vmatmul.msk.bf16.vlgmr.msra.gmra.mxu2 %vm464_vm0, %v2540_v10 }
 0x171   : > { %2160 = vmatmul.msk.bf16.vlgmr.msra.gmra.mxu3 %vm464_vm0, %v2540_v10 }
 0x176   : > { %v760_v25 = vpop.f32.mrf.mxu1 }
 0x177   : > { %v2139_v27 = vadd.f32 -1.0, %v760_v25 }
 0x178   : > { %v746_v28 = vpop.f32.mrf.mxu0  ;;  %2157 = vmatmul.msk.bf16.gmra.mxu1 %vm464_vm0, %v2553_v23 }
 0x179   : > { %v2138_v30 = vadd.f32 -1.0, %v746_v28  ;;  %v811_v33 = vmul.f32 1.442695, %v2139_v27 }
 0x17a   : > { %2155 = vmatmul.msk.bf16.gmra.mxu0 %vm464_vm0, %v2553_v23 }
 0x17b   : > { %v809_v34 = vmul.f32 1.442695, %v2138_v30  ;;  %2298 = vpow2.f32 %v811_v33 }
 0x17d   : > { %2300 = vpow2.f32 %v809_v34 }
 0x17e   : > { %v762_v36 = vpop.f32.mrf.mxu1  ;;  %v774_v39 = vpop.f32.mrf.mxu2  ;;  %2302 = vpow2.f32 %v801_v35 }
 0x17f   : > { %v967_v41 = vpack.c.bf16 %v762_v36, %v760_v25  ;;  %v2140_v44 = vadd.f32 -1.0, %v774_v39  ;;  %v788_v45 = vpop.f32.mrf.mxu3 }
 0x180   : > { %v748_v40 = vpop.f32.mrf.mxu0  ;;  %v2141_v48 = vadd.f32 -1.0, %v788_v45  ;;  %2159 = vmatmul.msk.bf16.gmra.mxu2 %vm464_vm0, %v2553_v23 }
 0x181   : > { %v966_v46 = vpack.c.bf16 %v748_v40, %v746_v28  ;;  %1091 = vmatpush.bf16.msrb.mxu1 %v967_v41  ;;  %v813_v51 = vmul.f32 1.442695, %v2140_v44  ;;  %2161 = vmatmul.msk.bf16.gmra.mxu3 %vm464_vm0, %v2553_v23  ;;  %v2299_v55 = vpop.eup %2298 }
 0x182   : > { %v815_v54 = vmul.f32 1.442695, %v2141_v48  ;;  %v1928_v0 = vrot.slane %v2299_v55, 3 }
 0x183   : > { %1072 = vmatpush.bf16.msrb.mxu0 %v966_v46  ;;  %2304 = vpow2.f32 %v813_v51  ;;  %v2301_v56 = vpop.eup %2300 }
 0x184   : > { %2306 = vpow2.f32 %v815_v54  ;;  %v2303_v62 = vpop.eup %2302  ;;  %v1927_v1 = vrot.slane %v2301_v56, 4 }
 0x185   : > { %1092 = vmatpush.bf16.msrb.mxu1 %v959_v49  ;;  %v1932_v11 = vsel %vm1931_vm1, %v2303_v62, %v1924_v57 }
 0x186   : > { %v776_v59 = vpop.f32.mrf.mxu2  ;;  %v1938_v15 = vsel %vm1937_vm3, %v1927_v1, %v1928_v0  ;;  %v1936_v18 = vsel %vm1935_vm4, %v1932_v11, %v1934_v14 }
 0x187   : > { %1073 = vmatpush.bf16.msrb.mxu0 %v958_v52  ;;  %v790_v2 = vpop.f32.mrf.mxu3  ;;  %v968_v3 = vpack.c.bf16 %v776_v59, %v774_v39 }
 0x188   : > { %2164 = vmatmul.msk.bf16.vlgmr.msrb.gmra.mxu1 %vm464_vm0, %v2540_v10  ;;  %v969_v6 = vpack.c.bf16 %v790_v2, %v788_v45 }
 0x189   : > { %v2305_v7 = vpop.eup %2304  ;;  %1110 = vmatpush.bf16.msrb.mxu2 %v968_v3 }
 0x18a   : > { %2162 = vmatmul.msk.bf16.vlgmr.msrb.gmra.mxu0 %vm464_vm0, %v2540_v10  ;;  %v2307_v9 = vpop.eup %2306  ;;  %v1929_v12 = vrot.slane %v2305_v7, 2  ;;  %1129 = vmatpush.bf16.msrb.mxu3 %v969_v6 }
 0x18b   : > { %v1930_v16 = vrot.slane %v2307_v9, 1 }
 0x18d   : > { %v1940_v17 = vsel %vm1939_vm5, %v1929_v12, %v1930_v16  ;;  %1111 = vmatpush.bf16.msrb.mxu2 %v960_v8 }
 0x18e   : > { %v1942_v19 = vsel %vm1941_vm6, %v1938_v15, %v1940_v17  ;;  %1130 = vmatpush.bf16.msrb.mxu3 %v961_v13 }
 0x18f   : > { %v1943_v20 = vsel %vm1903_vm7, %v1936_v18, %v1942_v19 }
 0x190   : > { %2238 = vst [vmem:[%s2573_s16 + $0x3] ss:$4 sm:$0xff] %v1943_v20  ;;  %2166 = vmatmul.msk.bf16.vlgmr.msrb.gmra.mxu2 %vm464_vm0, %v2540_v10 }
 0x191   : > { %2168 = vmatmul.msk.bf16.vlgmr.msrb.gmra.mxu3 %vm464_vm0, %v2540_v10 }
 0x198   : > { %2165 = vmatmul.msk.bf16.gmra.mxu1 %vm464_vm0, %v2553_v23 }
 0x19a   : > { %2163 = vmatmul.msk.bf16.gmra.mxu0 %vm464_vm0, %v2553_v23 }
 0x1a0   : > { %2167 = vmatmul.msk.bf16.gmra.mxu2 %vm464_vm0, %v2553_v23 }
 0x1a1   : > { %2169 = vmatmul.msk.bf16.gmra.mxu3 %vm464_vm0, %v2553_v23 }
 0x1e5   : > { %v1018_v21 = vpop.f32.mrf.mxu1 }
 0x1e6   : > { %v1143_v34 = vmax.f32 %v1018_v21, 0.0 }
 0x1e7   : > { %v999_v22 = vpop.f32.mrf.mxu0 }
 0x1e8   : > { %v1142_v38 = vmax.f32 %v999_v22, 0.0 }
 0x1ed   : > { %v1020_v24 = vpop.f32.mrf.mxu1 }
 0x1ee   : > { %v1151_v35 = vmax.f32 %v1020_v24, 0.0 }
 0x1ef   : > { %v1001_v25 = vpop.f32.mrf.mxu0 }
 0x1f0   : > { %v1150_v39 = vmax.f32 %v1001_v25, 0.0  ;;  %v1179_v42 = vpack.c.bf16 %v1151_v35, %v1143_v34 }
 0x1f2   : > { %v1178_v43 = vpack.c.bf16 %v1150_v39, %v1142_v38 }
 0x1f3   : > { %v1037_v26 = vpop.f32.mrf.mxu2 }
 0x1f4   : > { %v1056_v27 = vpop.f32.mrf.mxu3  ;;  %v1144_v61 = vmax.f32 %v1037_v26, 0.0 }
 0x1f5   : > { %v1023_v28 = vpop.f32.mrf.mxu1  ;;  %v1145_v62 = vmax.f32 %v1056_v27, 0.0 }
 0x1f6   : > { %v1159_v29 = vmax.f32 %v1023_v28, 0.0 }
 0x1f7   : > { %v1004_v10 = vpop.f32.mrf.mxu0 }
 0x1f8   : > { %v1158_v31 = vmax.f32 %v1004_v10, 0.0 }
 0x1fb   : > { %v1039_v30 = vpop.f32.mrf.mxu2 }
 0x1fc   : > { %v1058_v32 = vpop.f32.mrf.mxu3  ;;  %v1152_v57 = vmax.f32 %v1039_v30, 0.0 }
 0x1fd   : > { %v1025_v33 = vpop.f32.mrf.mxu1  ;;  %v1153_v59 = vmax.f32 %v1058_v32, 0.0 }
 0x1fe   : > { %v1167_v36 = vmax.f32 %v1025_v33, 0.0  ;;  %v1180_v63 = vpack.c.bf16 %v1152_v57, %v1144_v61 }
 0x1ff   : > { %v1006_v37 = vpop.f32.mrf.mxu0  ;;  %v1181_v0 = vpack.c.bf16 %v1153_v59, %v1145_v62 }
 0x200   : > { %v1166_v23 = vmax.f32 %v1006_v37, 0.0  ;;  %v1187_v40 = vpack.c.bf16 %v1167_v36, %v1159_v29 }
 0x202   : > { %v1186_v41 = vpack.c.bf16 %v1166_v23, %v1158_v31  ;;  %1235 = vmatpush.bf16.msra.mxu1 %v1187_v40 }
 0x203   : > { %v1042_v44 = vpop.f32.mrf.mxu2 }
 0x204   : > { %1216 = vmatpush.bf16.msra.mxu0 %v1186_v41  ;;  %v1061_v45 = vpop.f32.mrf.mxu3  ;;  %v1160_v50 = vmax.f32 %v1042_v44, 0.0 }
 0x205   : > { %v1094_v46 = vpop.f32.mrf.mxu1  ;;  %v1161_v54 = vmax.f32 %v1061_v45, 0.0 }
 0x206   : > { %1236 = vmatpush.bf16.msra.mxu1 %v1179_v42  ;;  %v1147_v12 = vmax.f32 %v1094_v46, 0.0 }
 0x207   : > { %v1075_v48 = vpop.f32.mrf.mxu0 }
 0x208   : > { %1217 = vmatpush.bf16.msra.mxu0 %v1178_v43  ;;  %v1146_v16 = vmax.f32 %v1075_v48, 0.0 }
 0x209   : > { %2180 = vmatmul.msk.bf16.vlgmr.msra.gmra.mxu1 %vm464_vm0, %v2593_v47 }
 0x20b   : > { %2178 = vmatmul.msk.bf16.vlgmr.msra.gmra.mxu0 %vm464_vm0, %v2593_v47  ;;  %v1044_v49 = vpop.f32.mrf.mxu2 }
 0x20c   : > { %v1168_v51 = vmax.f32 %v1044_v49, 0.0  ;;  %v1063_v52 = vpop.f32.mrf.mxu3 }
 0x20d   : > { %v1096_v53 = vpop.f32.mrf.mxu1  ;;  %v1169_v55 = vmax.f32 %v1063_v52, 0.0 }
 0x20e   : > { %v1188_v58 = vpack.c.bf16 %v1168_v51, %v1160_v50  ;;  %v1155_v13 = vmax.f32 %v1096_v53, 0.0 }
 0x20f   : > { %v1077_v56 = vpop.f32.mrf.mxu0  ;;  %v1189_v60 = vpack.c.bf16 %v1169_v55, %v1161_v54 }
 0x210   : > { %1254 = vmatpush.bf16.msra.mxu2 %v1188_v58  ;;  %v1154_v17 = vmax.f32 %v1077_v56, 0.0  ;;  %v1183_v21 = vpack.c.bf16 %v1155_v13, %v1147_v12 }
 0x211   : > { %1273 = vmatpush.bf16.msra.mxu3 %v1189_v60 }
 0x212   : > { %v1182_v22 = vpack.c.bf16 %v1154_v17, %v1146_v16 }
 0x213   : > { %v1113_v1 = vpop.f32.mrf.mxu2 }
 0x214   : > { %v1132_v2 = vpop.f32.mrf.mxu3  ;;  %1255 = vmatpush.bf16.msra.mxu2 %v1180_v63  ;;  %v1148_v35 = vmax.f32 %v1113_v1, 0.0  ;;  %v2625_v63 = vld [vmem:[%s2741_s5 + $0x10] sm:$0xff] }
 0x215   : > { %v1099_v3 = vpop.f32.mrf.mxu1  ;;  %1274 = vmatpush.bf16.msra.mxu3 %v1181_v0  ;;  %v1149_v36 = vmax.f32 %v1132_v2, 0.0 }
 0x216   : > { %v1163_v6 = vmax.f32 %v1099_v3, 0.0 }
 0x217   : > { %v1080_v5 = vpop.f32.mrf.mxu0  ;;  %2182 = vmatmul.msk.bf16.vlgmr.msra.gmra.mxu2 %vm464_vm0, %v2593_v47 }
 0x218   : > { %2184 = vmatmul.msk.bf16.vlgmr.msra.gmra.mxu3 %vm464_vm0, %v2593_v47  ;;  %v1162_v8 = vmax.f32 %v1080_v5, 0.0 }
 0x219   : > { %2181 = vmatmul.msk.bf16.gmra.mxu1 %vm464_vm0, %v2264_v4 }
 0x21b   : > { %2179 = vmatmul.msk.bf16.gmra.mxu0 %vm464_vm0, %v2264_v4  ;;  %v1115_v7 = vpop.f32.mrf.mxu2 }
 0x21c   : > { %v1134_v9 = vpop.f32.mrf.mxu3  ;;  %v1156_v31 = vmax.f32 %v1115_v7, 0.0 }
 0x21d   : > { %v1101_v11 = vpop.f32.mrf.mxu1  ;;  %v1157_v33 = vmax.f32 %v1134_v9, 0.0 }
 0x21e   : > { %v1171_v14 = vmax.f32 %v1101_v11, 0.0  ;;  %v1184_v37 = vpack.c.bf16 %v1156_v31, %v1148_v35 }
 0x21f   : > { %v1082_v15 = vpop.f32.mrf.mxu0  ;;  %v1185_v38 = vpack.c.bf16 %v1157_v33, %v1149_v36 }
 0x220   : > { %v1170_v18 = vmax.f32 %v1082_v15, 0.0  ;;  %v1191_v19 = vpack.c.bf16 %v1171_v14, %v1163_v6  ;;  %v2634_v15 = vld [vmem:[%s2741_s5 + $0x18] sm:$0xff] }
 0x222   : > { %v1190_v20 = vpack.c.bf16 %v1170_v18, %v1162_v8  ;;  %1311 = vmatpush.bf16.msrb.mxu1 %v1191_v19 }
 0x223   : > { %v1118_v24 = vpop.f32.mrf.mxu2 }
 0x224   : > { %1292 = vmatpush.bf16.msrb.mxu0 %v1190_v20  ;;  %v1137_v25 = vpop.f32.mrf.mxu3  ;;  %v1164_v27 = vmax.f32 %v1118_v24, 0.0 }
 0x225   : > { %v1165_v29 = vmax.f32 %v1137_v25, 0.0 }
 0x226   : > { %1312 = vmatpush.bf16.msrb.mxu1 %v1183_v21 }
 0x227   : > { %2183 = vmatmul.msk.bf16.gmra.mxu2 %vm464_vm0, %v2264_v4 }
 0x228   : > { %1293 = vmatpush.bf16.msrb.mxu0 %v1182_v22  ;;  %2185 = vmatmul.msk.bf16.gmra.mxu3 %vm464_vm0, %v2264_v4 }
 0x229   : > { %2188 = vmatmul.msk.bf16.vlgmr.msrb.gmra.mxu1 %vm464_vm0, %v2593_v47 }
 0x22b   : > { %2186 = vmatmul.msk.bf16.vlgmr.msrb.gmra.mxu0 %vm464_vm0, %v2593_v47  ;;  %v1120_v26 = vpop.f32.mrf.mxu2 }
 0x22c   : > { %v1172_v28 = vmax.f32 %v1120_v26, 0.0  ;;  %v1139_v10 = vpop.f32.mrf.mxu3 }
 0x22d   : > { %v1173_v30 = vmax.f32 %v1139_v10, 0.0 }
 0x22e   : > { %v1192_v32 = vpack.c.bf16 %v1172_v28, %v1164_v27 }
 0x22f   : > { %v1193_v34 = vpack.c.bf16 %v1173_v30, %v1165_v29 }
 0x230   : > { %1330 = vmatpush.bf16.msrb.mxu2 %v1192_v32 }
 0x231   : > { %1349 = vmatpush.bf16.msrb.mxu3 %v1193_v34 }
 0x234   : > { %1331 = vmatpush.bf16.msrb.mxu2 %v1184_v37 }
 0x235   : > { %1350 = vmatpush.bf16.msrb.mxu3 %v1185_v38 }
 0x237   : > { %2190 = vmatmul.msk.bf16.vlgmr.msrb.gmra.mxu2 %vm464_vm0, %v2593_v47 }
 0x238   : > { %2192 = vmatmul.msk.bf16.vlgmr.msrb.gmra.mxu3 %vm464_vm0, %v2593_v47 }
 0x239   : > { %2189 = vmatmul.msk.bf16.gmra.mxu1 %vm464_vm0, %v2264_v4 }
 0x23b   : > { %2187 = vmatmul.msk.bf16.gmra.mxu0 %vm464_vm0, %v2264_v4 }
 0x247   : > { %2191 = vmatmul.msk.bf16.gmra.mxu2 %vm464_vm0, %v2264_v4 }
 0x248   : > { %2193 = vmatmul.msk.bf16.gmra.mxu3 %vm464_vm0, %v2264_v4 }
 0x286   : > { %v1238_v39 = vpop.f32.mrf.mxu1 }
 0x287   : > { %v1363_v47 = vmax.f32 %v1238_v39, 0.0 }
 0x288   : > { %v1219_v23 = vpop.f32.mrf.mxu0 }
 0x289   : > { %v1362_v53 = vmax.f32 %v1219_v23, 0.0 }
 0x28e   : > { %v1240_v40 = vpop.f32.mrf.mxu1 }
 0x28f   : > { %v1371_v50 = vmax.f32 %v1240_v40, 0.0 }
 0x290   : > { %v1221_v41 = vpop.f32.mrf.mxu0 }
 0x291   : > { %v1370_v54 = vmax.f32 %v1221_v41, 0.0  ;;  %v1400_v58 = vpack.c.bf16 %v1371_v50, %v1363_v47 }
 0x293   : > { %v1399_v60 = vpack.c.bf16 %v1370_v54, %v1362_v53 }
 0x296   : > { %v1243_v42 = vpop.f32.mrf.mxu1 }
 0x297   : > { %v1379_v46 = vmax.f32 %v1243_v42, 0.0 }
 0x298   : > { %v1224_v43 = vpop.f32.mrf.mxu0 }
 0x299   : > { %v1378_v48 = vmax.f32 %v1224_v43, 0.0 }
 0x29a   : > { %v1257_v44 = vpop.f32.mrf.mxu2 }
 0x29b   : > { %v1276_v45 = vpop.f32.mrf.mxu3  ;;  %v1364_v19 = vmax.f32 %v1257_v44, 0.0 }
 0x29c   : > { %v1365_v20 = vmax.f32 %v1276_v45, 0.0 }
 0x29e   : > { %v1245_v49 = vpop.f32.mrf.mxu1 }
 0x29f   : > { %v1387_v51 = vmax.f32 %v1245_v49, 0.0 }
 0x2a0   : > { %v1226_v52 = vpop.f32.mrf.mxu0 }
 0x2a1   : > { %v1386_v55 = vmax.f32 %v1226_v52, 0.0  ;;  %v1408_v56 = vpack.c.bf16 %v1387_v51, %v1379_v46 }
 0x2a2   : > { %v1259_v59 = vpop.f32.mrf.mxu2 }
 0x2a3   : > { %v1407_v57 = vpack.c.bf16 %v1386_v55, %v1378_v48  ;;  %1456 = vmatpush.bf16.msra.mxu1 %v1408_v56  ;;  %v1278_v61 = vpop.f32.mrf.mxu3  ;;  %v1372_v12 = vmax.f32 %v1259_v59, 0.0 }
 0x2a4   : > { %v1373_v16 = vmax.f32 %v1278_v61, 0.0 }
 0x2a5   : > { %1437 = vmatpush.bf16.msra.mxu0 %v1407_v57  ;;  %v1401_v21 = vpack.c.bf16 %v1372_v12, %v1364_v19 }
 0x2a6   : > { %v1314_v62 = vpop.f32.mrf.mxu1  ;;  %v1402_v22 = vpack.c.bf16 %v1373_v16, %v1365_v20 }
 0x2a7   : > { %1457 = vmatpush.bf16.msra.mxu1 %v1400_v58  ;;  %v1367_v10 = vmax.f32 %v1314_v62, 0.0 }
 0x2a8   : > { %v1295_v0 = vpop.f32.mrf.mxu0 }
 0x2a9   : > { %1438 = vmatpush.bf16.msra.mxu0 %v1399_v60  ;;  %v1366_v32 = vmax.f32 %v1295_v0, 0.0 }
 0x2aa   : > { %2208 = vmatmul.msk.bf16.vlgmr.msra.gmra.mxu1 %vm464_vm0, %v2625_v63  ;;  %v1262_v1 = vpop.f32.mrf.mxu2 }
 0x2ab   : > { %v1281_v2 = vpop.f32.mrf.mxu3  ;;  %v1380_v6 = vmax.f32 %v1262_v1, 0.0 }
 0x2ac   : > { %2206 = vmatmul.msk.bf16.vlgmr.msra.gmra.mxu0 %vm464_vm0, %v2625_v63  ;;  %v1381_v9 = vmax.f32 %v1281_v2, 0.0 }
 0x2ae   : > { %v1316_v3 = vpop.f32.mrf.mxu1 }
 0x2af   : > { %v1375_v29 = vmax.f32 %v1316_v3, 0.0 }
 0x2b0   : > { %v1297_v4 = vpop.f32.mrf.mxu0 }
 0x2b1   : > { %v1374_v33 = vmax.f32 %v1297_v4, 0.0  ;;  %v1404_v37 = vpack.c.bf16 %v1375_v29, %v1367_v10 }
 0x2b2   : > { %v1264_v5 = vpop.f32.mrf.mxu2 }
 0x2b3   : > { %v1388_v7 = vmax.f32 %v1264_v5, 0.0  ;;  %v1283_v8 = vpop.f32.mrf.mxu3  ;;  %v1403_v39 = vpack.c.bf16 %v1374_v33, %v1366_v32 }
 0x2b4   : > { %v1389_v11 = vmax.f32 %v1283_v8, 0.0 }
 0x2b5   : > { %v1409_v13 = vpack.c.bf16 %v1388_v7, %v1380_v6 }
 0x2b6   : > { %v1319_v14 = vpop.f32.mrf.mxu1  ;;  %v1410_v17 = vpack.c.bf16 %v1389_v11, %v1381_v9 }
 0x2b7   : > { %1475 = vmatpush.bf16.msra.mxu2 %v1409_v13  ;;  %v1383_v26 = vmax.f32 %v1319_v14, 0.0 }
 0x2b8   : > { %v1300_v18 = vpop.f32.mrf.mxu0  ;;  %1494 = vmatpush.bf16.msra.mxu3 %v1410_v17 }
 0x2b9   : > { %v1382_v27 = vmax.f32 %v1300_v18, 0.0  ;;  %v2667_v18 = vld [vmem:[%s2742_s6] sm:$0x3] }
 0x2ba   : > { %2209 = vmatmul.msk.bf16.gmra.mxu1 %vm464_vm0, %v2634_v15  ;;  %v1333_v24 = vpop.f32.mrf.mxu2 }
 0x2bb   : > { %v1352_v25 = vpop.f32.mrf.mxu3  ;;  %1476 = vmatpush.bf16.msra.mxu2 %v1401_v21  ;;  %v1368_v52 = vmax.f32 %v1333_v24, 0.0 }
 0x2bc   : > { %2207 = vmatmul.msk.bf16.gmra.mxu0 %vm464_vm0, %v2634_v15  ;;  %1495 = vmatpush.bf16.msra.mxu3 %v1402_v22  ;;  %v1369_v53 = vmax.f32 %v1352_v25, 0.0 }
 0x2be   : > { %v1321_v28 = vpop.f32.mrf.mxu1  ;;  %2210 = vmatmul.msk.bf16.vlgmr.msra.gmra.mxu2 %vm464_vm0, %v2625_v63 }
 0x2bf   : > { %v1391_v30 = vmax.f32 %v1321_v28, 0.0  ;;  %2212 = vmatmul.msk.bf16.vlgmr.msra.gmra.mxu3 %vm464_vm0, %v2625_v63 }
 0x2c0   : > { %v1302_v31 = vpop.f32.mrf.mxu0 }
 0x2c1   : > { %v1390_v34 = vmax.f32 %v1302_v31, 0.0  ;;  %v1412_v35 = vpack.c.bf16 %v1391_v30, %v1383_v26 }
 0x2c2   : > { %v1335_v38 = vpop.f32.mrf.mxu2 }
 0x2c3   : > { %v1411_v36 = vpack.c.bf16 %v1390_v34, %v1382_v27  ;;  %1532 = vmatpush.bf16.msrb.mxu1 %v1412_v35  ;;  %v1354_v23 = vpop.f32.mrf.mxu3  ;;  %v1376_v49 = vmax.f32 %v1335_v38, 0.0 }
 0x2c4   : > { %v1377_v50 = vmax.f32 %v1354_v23, 0.0 }
 0x2c5   : > { %1513 = vmatpush.bf16.msrb.mxu0 %v1411_v36  ;;  %v1405_v54 = vpack.c.bf16 %v1376_v49, %v1368_v52 }
 0x2c6   : > { %v1406_v55 = vpack.c.bf16 %v1377_v50, %v1369_v53 }
 0x2c7   : > { %1533 = vmatpush.bf16.msrb.mxu1 %v1404_v37 }
 0x2c9   : > { %1514 = vmatpush.bf16.msrb.mxu0 %v1403_v39 }
 0x2ca   : > { %2216 = vmatmul.msk.bf16.vlgmr.msrb.gmra.mxu1 %vm464_vm0, %v2625_v63  ;;  %v1338_v40 = vpop.f32.mrf.mxu2 }
 0x2cb   : > { %v1357_v41 = vpop.f32.mrf.mxu3  ;;  %v1384_v43 = vmax.f32 %v1338_v40, 0.0 }
 0x2cc   : > { %2214 = vmatmul.msk.bf16.vlgmr.msrb.gmra.mxu0 %vm464_vm0, %v2625_v63  ;;  %v1385_v46 = vmax.f32 %v1357_v41, 0.0 }
 0x2ce   : > { %2211 = vmatmul.msk.bf16.gmra.mxu2 %vm464_vm0, %v2634_v15 }
 0x2cf   : > { %2213 = vmatmul.msk.bf16.gmra.mxu3 %vm464_vm0, %v2634_v15 }
 0x2d2   : > { %v1340_v42 = vpop.f32.mrf.mxu2 }
 0x2d3   : > { %v1392_v44 = vmax.f32 %v1340_v42, 0.0  ;;  %v1359_v45 = vpop.f32.mrf.mxu3 }
 0x2d4   : > { %v1393_v48 = vmax.f32 %v1359_v45, 0.0 }
 0x2d5   : > { %v1413_v47 = vpack.c.bf16 %v1392_v44, %v1384_v43 }
 0x2d6   : > { %v1414_v51 = vpack.c.bf16 %v1393_v48, %v1385_v46 }
 0x2d7   : > { %1551 = vmatpush.bf16.msrb.mxu2 %v1413_v47 }
 0x2d8   : > { %1570 = vmatpush.bf16.msrb.mxu3 %v1414_v51 }
 0x2da   : > { %2217 = vmatmul.msk.bf16.gmra.mxu1 %vm464_vm0, %v2634_v15 }
 0x2db   : > { %1552 = vmatpush.bf16.msrb.mxu2 %v1405_v54 }
 0x2dc   : > { %2215 = vmatmul.msk.bf16.gmra.mxu0 %vm464_vm0, %v2634_v15  ;;  %1571 = vmatpush.bf16.msrb.mxu3 %v1406_v55 }
 0x2de   : > { %2218 = vmatmul.msk.bf16.vlgmr.msrb.gmra.mxu2 %vm464_vm0, %v2625_v63 }
 0x2df   : > { %2220 = vmatmul.msk.bf16.vlgmr.msrb.gmra.mxu3 %vm464_vm0, %v2625_v63 }
 0x2ee   : > { %2219 = vmatmul.msk.bf16.gmra.mxu2 %vm464_vm0, %v2634_v15 }
 0x2ef   : > { %2221 = vmatmul.msk.bf16.gmra.mxu3 %vm464_vm0, %v2634_v15 }
 0x327   : > { %v1459_v56 = vpop.f32.mrf.mxu1 }
 0x328   : > { %v1584_v2 = vmax.f32 %v1459_v56, 0.0 }
 0x329   : > { %v1440_v57 = vpop.f32.mrf.mxu0 }
 0x32a   : > { %v1583_v63 = vmax.f32 %v1440_v57, 0.0 }
 0x32f   : > { %v1461_v58 = vpop.f32.mrf.mxu1 }
 0x330   : > { %v1592_v3 = vmax.f32 %v1461_v58, 0.0 }
 0x331   : > { %v1442_v59 = vpop.f32.mrf.mxu0 }
 0x332   : > { %v1591_v6 = vmax.f32 %v1442_v59, 0.0  ;;  %v1617_v13 = vpack.c.bf16 %v1592_v3, %v1584_v2 }
 0x334   : > { %v1616_v14 = vpack.c.bf16 %v1591_v6, %v1583_v63 }
 0x337   : > { %v1464_v60 = vpop.f32.mrf.mxu1 }
 0x338   : > { %v1600_v62 = vmax.f32 %v1464_v60, 0.0 }
 0x339   : > { %v1445_v61 = vpop.f32.mrf.mxu0 }
 0x33a   : > { %v1599_v0 = vmax.f32 %v1445_v61, 0.0 }
 0x33f   : > { %v1466_v1 = vpop.f32.mrf.mxu1 }
 0x340   : > { %v1608_v4 = vmax.f32 %v1466_v1, 0.0 }
 0x341   : > { %v1447_v5 = vpop.f32.mrf.mxu0  ;;  %v1478_v8 = vpop.f32.mrf.mxu2 }
 0x342   : > { %v1607_v7 = vmax.f32 %v1447_v5, 0.0  ;;  %v1625_v9 = vpack.c.bf16 %v1608_v4, %v1600_v62  ;;  %v1497_v11 = vpop.f32.mrf.mxu3  ;;  %v1585_v37 = vmax.f32 %v1478_v8, 0.0 }
 0x343   : > { %v1586_v23 = vmax.f32 %v1497_v11, 0.0 }
 0x344   : > { %v1624_v12 = vpack.c.bf16 %v1607_v7, %v1599_v0  ;;  %1654 = vmatpush.bf16.msra.mxu1 %v1625_v9 }
 0x346   : > { %1641 = vmatpush.bf16.msra.mxu0 %v1624_v12 }
 0x347   : > { %v1535_v15 = vpop.f32.mrf.mxu1 }
 0x348   : > { %1655 = vmatpush.bf16.msra.mxu1 %v1617_v13  ;;  %v1588_v40 = vmax.f32 %v1535_v15, 0.0 }
 0x349   : > { %v1516_v16 = vpop.f32.mrf.mxu0  ;;  %v1480_v17 = vpop.f32.mrf.mxu2 }
 0x34a   : > { %1642 = vmatpush.bf16.msra.mxu0 %v1616_v14  ;;  %v1499_v19 = vpop.f32.mrf.mxu3  ;;  %v1593_v32 = vmax.f32 %v1480_v17, 0.0  ;;  %v1587_v45 = vmax.f32 %v1516_v16, 0.0 }
 0x34b   : > { %2223 = vmatmul.msk.bf16.vlgmr.msra.gmra.mxu1 %vm464_vm0, %v2667_v18  ;;  %v1594_v34 = vmax.f32 %v1499_v19, 0.0 }
 0x34c   : > { %v1618_v44 = vpack.c.bf16 %v1593_v32, %v1585_v37 }
 0x34d   : > { %2222 = vmatmul.msk.bf16.vlgmr.msra.gmra.mxu0 %vm464_vm0, %v2667_v18  ;;  %v1619_v49 = vpack.c.bf16 %v1594_v34, %v1586_v23 }
 0x34f   : > { %v1537_v20 = vpop.f32.mrf.mxu1 }
 0x350   : > { %v1596_v41 = vmax.f32 %v1537_v20, 0.0 }
 0x351   : > { %v1518_v21 = vpop.f32.mrf.mxu0  ;;  %v1483_v22 = vpop.f32.mrf.mxu2 }
 0x352   : > { %v1502_v24 = vpop.f32.mrf.mxu3  ;;  %v1601_v28 = vmax.f32 %v1483_v22, 0.0  ;;  %v1595_v46 = vmax.f32 %v1518_v21, 0.0  ;;  %v1621_v53 = vpack.c.bf16 %v1596_v41, %v1588_v40 }
 0x353   : > { %v1602_v30 = vmax.f32 %v1502_v24, 0.0 }
 0x354   : > { %v1620_v54 = vpack.c.bf16 %v1595_v46, %v1587_v45 }
 0x357   : > { %v1540_v25 = vpop.f32.mrf.mxu1 }
 0x358   : > { %v1604_v36 = vmax.f32 %v1540_v25, 0.0 }
 0x359   : > { %v1521_v26 = vpop.f32.mrf.mxu0  ;;  %v1485_v27 = vpop.f32.mrf.mxu2 }
 0x35a   : > { %v1609_v10 = vmax.f32 %v1485_v27, 0.0  ;;  %v1504_v29 = vpop.f32.mrf.mxu3  ;;  %v1603_v38 = vmax.f32 %v1521_v26, 0.0 }
 0x35b   : > { %v1610_v31 = vmax.f32 %v1504_v29, 0.0 }
 0x35c   : > { %v1626_v33 = vpack.c.bf16 %v1609_v10, %v1601_v28 }
 0x35d   : > { %v1627_v35 = vpack.c.bf16 %v1610_v31, %v1602_v30 }
 0x35e   : > { %1667 = vmatpush.bf16.msra.mxu2 %v1626_v33 }
 0x35f   : > { %v1542_v39 = vpop.f32.mrf.mxu1  ;;  %1680 = vmatpush.bf16.msra.mxu3 %v1627_v35 }
 0x360   : > { %v1612_v42 = vmax.f32 %v1542_v39, 0.0 }
 0x361   : > { %v1523_v43 = vpop.f32.mrf.mxu0  ;;  %v1554_v47 = vpop.f32.mrf.mxu2 }
 0x362   : > { %v1611_v48 = vmax.f32 %v1523_v43, 0.0  ;;  %v1629_v50 = vpack.c.bf16 %v1612_v42, %v1604_v36  ;;  %v1573_v51 = vpop.f32.mrf.mxu3  ;;  %1668 = vmatpush.bf16.msra.mxu2 %v1618_v44  ;;  %v1589_v63 = vmax.f32 %v1554_v47, 0.0 }
 0x363   : > { %1681 = vmatpush.bf16.msra.mxu3 %v1619_v49  ;;  %v1590_v6 = vmax.f32 %v1573_v51, 0.0 }
 0x364   : > { %v1628_v52 = vpack.c.bf16 %v1611_v48, %v1603_v38  ;;  %1706 = vmatpush.bf16.msrb.mxu1 %v1629_v50 }
 0x365   : > { %2224 = vmatmul.msk.bf16.vlgmr.msra.gmra.mxu2 %vm464_vm0, %v2667_v18 }
 0x366   : > { %1693 = vmatpush.bf16.msrb.mxu0 %v1628_v52  ;;  %2225 = vmatmul.msk.bf16.vlgmr.msra.gmra.mxu3 %vm464_vm0, %v2667_v18 }
 0x368   : > { %1707 = vmatpush.bf16.msrb.mxu1 %v1621_v53 }
 0x369   : > { %v1556_v55 = vpop.f32.mrf.mxu2 }
 0x36a   : > { %1694 = vmatpush.bf16.msrb.mxu0 %v1620_v54  ;;  %v1575_v56 = vpop.f32.mrf.mxu3  ;;  %v1597_v2 = vmax.f32 %v1556_v55, 0.0 }
 0x36b   : > { %2227 = vmatmul.msk.bf16.vlgmr.msrb.gmra.mxu1 %vm464_vm0, %v2667_v18  ;;  %v1598_v4 = vmax.f32 %v1575_v56, 0.0 }
 0x36c   : > { %v1622_v7 = vpack.c.bf16 %v1597_v2, %v1589_v63 }
 0x36d   : > { %2226 = vmatmul.msk.bf16.vlgmr.msrb.gmra.mxu0 %vm464_vm0, %v2667_v18  ;;  %v1623_v8 = vpack.c.bf16 %v1598_v4, %v1590_v6 }
 0x371   : > { %v1559_v57 = vpop.f32.mrf.mxu2 }
 0x372   : > { %v1578_v58 = vpop.f32.mrf.mxu3  ;;  %v1605_v60 = vmax.f32 %v1559_v57, 0.0 }
 0x373   : > { %v1606_v0 = vmax.f32 %v1578_v58, 0.0 }
 0x379   : > { %v1561_v59 = vpop.f32.mrf.mxu2 }
 0x37a   : > { %v1613_v61 = vmax.f32 %v1561_v59, 0.0  ;;  %v1580_v62 = vpop.f32.mrf.mxu3 }
 0x37b   : > { %v1614_v1 = vmax.f32 %v1580_v62, 0.0 }
 0x37c   : > { %v1630_v3 = vpack.c.bf16 %v1613_v61, %v1605_v60 }
 0x37d   : > { %v1631_v5 = vpack.c.bf16 %v1614_v1, %v1606_v0 }
 0x37e   : > { %1719 = vmatpush.bf16.msrb.mxu2 %v1630_v3 }
 0x37f   : > { %1732 = vmatpush.bf16.msrb.mxu3 %v1631_v5 }
 0x382   : > { %1720 = vmatpush.bf16.msrb.mxu2 %v1622_v7 }
 0x383   : > { %1733 = vmatpush.bf16.msrb.mxu3 %v1623_v8 }
 0x385   : > { %2228 = vmatmul.msk.bf16.vlgmr.msrb.gmra.mxu2 %vm464_vm0, %v2667_v18 }
 0x386   : > { %2229 = vmatmul.msk.bf16.vlgmr.msrb.gmra.mxu3 %vm464_vm0, %v2667_v18 }
 0x3c8   : > { %v1657_v9 = vpop.f32.mrf.mxu1 }
 0x3c9   : > { %v2231_v11 = vmul.f32 -1.442695, %v1657_v9 }
 0x3ca   : > { %v1644_v12 = vpop.f32.mrf.mxu0 }
 0x3cb   : > { %2308 = vpow2.f32 %v2231_v11  ;;  %v2230_v13 = vmul.f32 -1.442695, %v1644_v12 }
 0x3cd   : > { %2310 = vpow2.f32 %v2230_v13 }
 0x3d0   : > { %v1659_v14 = vpop.f32.mrf.mxu1 }
 0x3d1   : > { %v2309_v15 = vpop.eup %2308 }
 0x3d2   : > { %v1764_v16 = vadd.f32 1.0, %v2309_v15  ;;  %v1646_v17 = vpop.f32.mrf.mxu0 }
 0x3d3   : > { %v2311_v19 = vpop.eup %2310 }
 0x3d4   : > { %2312 = vrcp.f32 %v1764_v16  ;;  %v1763_v20 = vadd.f32 1.0, %v2311_v19  ;;  %vm1791_vm8 = vweird.f32 %v1764_v16  ;;  %v1797_v18 = vand.u32 2147483648, %v1764_v16 }
 0x3d5   : > { %v1795_v25 = vand.u32 2147483647, %v1764_v16 }
 0x3d6   : > { %2314 = vrcp.f32 %v1763_v20  ;;  %v1798_v10 = vor.u32 1.1754944e-38, %v1797_v18  ;;  %vm1776_vm12 = vweird.f32 %v1763_v20  ;;  %v1780_v34 = vand.u32 2147483647, %v1763_v20 }
 0x3d7   : > { %vm1796_vm11 = vcmp.eq.f32.partialorder %v1795_v25, 8.507059e+37  ;;  %v1782_v35 = vand.u32 2147483648, %v1763_v20 }
 0x3d8   : > { %vm1781_vm15 = vcmp.eq.f32.partialorder %v1780_v34, 8.507059e+37 }
 0x3d9   : > { %v1783_v39 = vor.u32 1.1754944e-38, %v1782_v35 }
 0x3da   : > { %v2313_v21 = vpop.eup %2312 }
 0x3db   : > { %v1787_v22 = vmul.f32 %v2313_v21, %v1764_v16  ;;  %vm1792_vm9 = vweird.f32 %v2313_v21 }
 0x3dc   : > { %vm1793_vm10 = vmor %vm1791_vm8, %vm1792_vm9  ;;  %v2315_v27 = vpop.eup %2314 }
 0x3dd   : > { %v1788_v24 = vsub.f32 1.0, %v1787_v22  ;;  %v1772_v29 = vmul.f32 %v2315_v27, %v1763_v20  ;;  %vm1777_vm13 = vweird.f32 %v2315_v27 }
 0x3de   : > { %vm1778_vm14 = vmor %vm1776_vm12, %vm1777_vm13 }
 0x3df   : > { %v1789_v26 = vmul.f32 %v2313_v21, %v1788_v24  ;;  %v1773_v31 = vsub.f32 1.0, %v1772_v29 }
 0x3e1   : > { %v1790_v28 = vadd.f32 %v2313_v21, %v1789_v26  ;;  %v1774_v33 = vmul.f32 %v2315_v27, %v1773_v31 }
 0x3e3   : > { %v1794_v30 = vsel %vm1793_vm10, %v2313_v21, %v1790_v28  ;;  %v1775_v37 = vadd.f32 %v2315_v27, %v1774_v33 }
 0x3e4   : > { %v1799_v32 = vsel %vm1796_vm11, %v1798_v10, %v1794_v30 }
 0x3e5   : > { %v1899_v36 = vrot.slane %v1799_v32, 4  ;;  %v1779_v43 = vsel %vm1778_vm14, %v2315_v27, %v1775_v37 }
 0x3e6   : > { %v1784_v46 = vsel %vm1781_vm15, %v1783_v39, %v1779_v43 }
 0x3e7   : > { %v1904_v49 = vsel %vm1903_vm7, %v1784_v46, %v1899_v36 }
 0x3e8   : > { %v1709_v38 = vpop.f32.mrf.mxu1  ;;  %v1670_v23 = vpop.f32.mrf.mxu2  ;;  %1912 = vst [vmem:[%s2573_s16] sm:$0x77] %v1904_v49 }
 0x3e9   : > { %v2235_v40 = vmul.f32 -1.442695, %v1709_v38  ;;  %v1683_v42 = vpop.f32.mrf.mxu3  ;;  %v2232_v44 = vmul.f32 -1.442695, %v1670_v23 }
 0x3ea   : > { %v1696_v41 = vpop.f32.mrf.mxu0  ;;  %v2233_v45 = vmul.f32 -1.442695, %v1683_v42 }
 0x3eb   : > { %2316 = vpow2.f32 %v2235_v40  ;;  %v2234_v48 = vmul.f32 -1.442695, %v1696_v41 }
 0x3ec   : > { %2318 = vpow2.f32 %v2232_v44 }
 0x3ed   : > { %2320 = vpow2.f32 %v2233_v45 }
 0x3ee   : > { %2322 = vpow2.f32 %v2234_v48 }
 0x3f0   : > { %v1711_v47 = vpop.f32.mrf.mxu1  ;;  %v1672_v51 = vpop.f32.mrf.mxu2 }
 0x3f1   : > { %v2317_v50 = vpop.eup %2316  ;;  %v1685_v54 = vpop.f32.mrf.mxu3 }
 0x3f2   : > { %v1698_v52 = vpop.f32.mrf.mxu0  ;;  %v2319_v53 = vpop.eup %2318  ;;  %v1768_v55 = vadd.f32 1.0, %v2317_v50 }
 0x3f3   : > { %v2321_v56 = vpop.eup %2320  ;;  %v1765_v57 = vadd.f32 1.0, %v2319_v53 }
 0x3f4   : > { %v1766_v58 = vadd.f32 1.0, %v2321_v56  ;;  %2324 = vrcp.f32 %v1768_v55  ;;  %v2323_v59 = vpop.eup %2322  ;;  %vm1851_vm0 = vweird.f32 %v1768_v55  ;;  %v1855_v3 = vand.u32 2147483647, %v1768_v55 }
 0x3f5   : > { %2326 = vrcp.f32 %v1765_v57  ;;  %v1767_v60 = vadd.f32 1.0, %v2323_v59  ;;  %v1810_v62 = vand.u32 2147483647, %v1765_v57  ;;  %v1812_v1 = vand.u32 2147483648, %v1765_v57 }
 0x3f6   : > { %2328 = vrcp.f32 %v1766_v58  ;;  %v1825_v5 = vand.u32 2147483647, %v1766_v58  ;;  %vm1806_vm1 = vweird.f32 %v1765_v57  ;;  %v1857_v6 = vand.u32 2147483648, %v1768_v55 }
 0x3f7   : > { %2330 = vrcp.f32 %v1767_v60  ;;  %v1827_v8 = vand.u32 2147483648, %v1766_v58  ;;  %vm1821_vm3 = vweird.f32 %v1766_v58  ;;  %vm2687_vm5 = vcmp.eq.f32.partialorder %v1810_v62, 8.507059e+37 }
 0x3f8   : > { %v1813_v14 = vor.u32 1.1754944e-38, %v1812_v1  ;;  %vm2691_vm8 = vcmp.eq.f32.partialorder %v1825_v5, 8.507059e+37  ;;  %vm2700_vm10 = vcmp.eq.f32.partialorder %v1855_v3, 8.507059e+37  ;;  %v1858_v22 = vor.u32 1.1754944e-38, %v1857_v6 }
 0x3f9   : > { %v1828_v18 = vor.u32 1.1754944e-38, %v1827_v8  ;;  %vm1836_vm13 = vweird.f32 %v1767_v60  ;;  %v1840_v10 = vand.u32 2147483647, %v1767_v60  ;;  %v1842_v29 = vand.u32 2147483648, %v1767_v60 }
 0x3fa   : > { %v2325_v61 = vpop.eup %2324 }
 0x3fb   : > { %v2327_v0 = vpop.eup %2326  ;;  %v1847_v2 = vmul.f32 %v2325_v61, %v1768_v55  ;;  %vm1852_vm2 = vweird.f32 %v2325_v61  ;;  %v1843_v39 = vor.u32 1.1754944e-38, %v1842_v29 }
 0x3fc   : > { %v2329_v4 = vpop.eup %2328  ;;  %v1802_v63 = vmul.f32 %v2327_v0, %v1765_v57  ;;  %vm1807_vm4 = vweird.f32 %v2327_v0  ;;  %vm2696_vm9 = vmor %vm1851_vm0, %vm1852_vm2  ;;  %vm1841_vm0 = vcmp.eq.f32.partialorder %v1840_v10, 8.507059e+37 }
 0x3fd   : > { %v1817_v7 = vmul.f32 %v2329_v4, %v1766_v58  ;;  %v1848_v9 = vsub.f32 1.0, %v1847_v2  ;;  %vm1822_vm6 = vweird.f32 %v2329_v4  ;;  %v2331_v16 = vpop.eup %2330  ;;  %vm2705_vm11 = vmor %vm1806_vm1, %vm1807_vm4 }
 0x3fe   : > { %v1803_v11 = vsub.f32 1.0, %v1802_v63  ;;  %v1832_v27 = vmul.f32 %v2331_v16, %v1767_v60  ;;  %vm1823_vm12 = vmor %vm1821_vm3, %vm1822_vm6  ;;  %vm1837_vm14 = vweird.f32 %v2331_v16 }
 0x3ff   : > { %v1818_v13 = vsub.f32 1.0, %v1817_v7  ;;  %v1849_v15 = vmul.f32 %v2325_v61, %v1848_v9  ;;  %vm1838_vm15 = vmor %vm1836_vm13, %vm1837_vm14 }
 0x400   : > { %v1804_v19 = vmul.f32 %v2327_v0, %v1803_v11  ;;  %v1833_v32 = vsub.f32 1.0, %v1832_v27 }
 0x401   : > { %v1819_v24 = vmul.f32 %v2329_v4, %v1818_v13  ;;  %v1850_v26 = vadd.f32 %v2325_v61, %v1849_v15 }
 0x402   : > { %v1805_v28 = vadd.f32 %v2327_v0, %v1804_v19  ;;  %v1834_v36 = vmul.f32 %v2331_v16, %v1833_v32 }
 0x403   : > { %v1820_v30 = vadd.f32 %v2329_v4, %v1819_v24  ;;  %v1854_v31 = vsel %vm2696_vm9, %v2325_v61, %v1850_v26 }
 0x404   : > { %v1809_v33 = vsel %vm2705_vm11, %v2327_v0, %v1805_v28  ;;  %v1859_v34 = vsel %vm2700_vm10, %v1858_v22, %v1854_v31  ;;  %v1835_v41 = vadd.f32 %v2331_v16, %v1834_v36 }
 0x405   : > { %v1824_v35 = vsel %vm1823_vm12, %v2329_v4, %v1820_v30  ;;  %v1814_v38 = vsel %vm2687_vm5, %v1813_v14, %v1809_v33  ;;  %v1901_v40 = vrot.slane %v1859_v34, 4 }
 0x406   : > { %v1829_v37 = vsel %vm2691_vm8, %v1828_v18, %v1824_v35  ;;  %v1839_v43 = vsel %vm1838_vm15, %v2331_v16, %v1835_v41 }
 0x407   : > { %v1900_v23 = vrot.slane %v1829_v37, 4  ;;  %v1844_v46 = vsel %vm1841_vm0, %v1843_v39, %v1839_v43 }
 0x408   : > { %v1722_v44 = vpop.f32.mrf.mxu2  ;;  %v1906_v47 = vsel %vm1903_vm7, %v1844_v46, %v1901_v40 }
 0x409   : > { %v1905_v42 = vsel %vm1903_vm7, %v1814_v38, %v1900_v23  ;;  %v1735_v45 = vpop.f32.mrf.mxu3  ;;  %v2236_v48 = vmul.f32 -1.442695, %v1722_v44  ;;  %1914 = vst [vmem:[%s2573_s16 + $0x10] sm:$0x77] %v1906_v47 }
 0x40a   : > { %1913 = vst [vmem:[%s2573_s16 + $0x8] sm:$0x77] %v1905_v42  ;;  %v2237_v49 = vmul.f32 -1.442695, %v1735_v45 }
 0x40b   : > { %2332 = vpow2.f32 %v2236_v48 }
 0x40c   : > { %2334 = vpow2.f32 %v2237_v49 }
 0x410   : > { %v1724_v50 = vpop.f32.mrf.mxu2 }
 0x411   : > { %v2333_v51 = vpop.eup %2332  ;;  %v1737_v52 = vpop.f32.mrf.mxu3 }
 0x412   : > { %v2335_v53 = vpop.eup %2334  ;;  %v1769_v54 = vadd.f32 1.0, %v2333_v51 }
 0x413   : > { %v1770_v55 = vadd.f32 1.0, %v2335_v53 }
 0x414   : > { %2336 = vrcp.f32 %v1769_v54  ;;  %vm1866_vm3 = vweird.f32 %v1769_v54  ;;  %v1872_v4 = vand.u32 2147483648, %v1769_v54  ;;  %v1870_v63 = vand.u32 2147483647, %v1769_v54 }
 0x415   : > { %2338 = vrcp.f32 %v1770_v55  ;;  %v1887_v62 = vand.u32 2147483648, %v1770_v55  ;;  %v1885_v2 = vand.u32 2147483647, %v1770_v55  ;;  %vm1881_vm4 = vweird.f32 %v1770_v55 }
 0x416   : > { %v1873_v11 = vor.u32 1.1754944e-38, %v1872_v4  ;;  %vm1871_vm9 = vcmp.eq.f32.partialorder %v1870_v63, 8.507059e+37 }
 0x417   : > { %v1888_v6 = vor.u32 1.1754944e-38, %v1887_v62  ;;  %vm1886_vm8 = vcmp.eq.f32.partialorder %v1885_v2, 8.507059e+37 }
 0x41a   : > { %v2337_v56 = vpop.eup %2336 }
 0x41b   : > { %v2339_v57 = vpop.eup %2338  ;;  %v1862_v58 = vmul.f32 %v2337_v56, %v1769_v54  ;;  %vm1867_vm1 = vweird.f32 %v2337_v56 }
 0x41c   : > { %v1877_v59 = vmul.f32 %v2339_v57, %v1770_v55  ;;  %vm1882_vm2 = vweird.f32 %v2339_v57  ;;  %vm1868_vm5 = vmor %vm1866_vm3, %vm1867_vm1 }
 0x41d   : > { %v1863_v60 = vsub.f32 1.0, %v1862_v58  ;;  %vm1883_vm6 = vmor %vm1881_vm4, %vm1882_vm2 }
 0x41e   : > { %v1878_v61 = vsub.f32 1.0, %v1877_v59 }
 0x41f   : > { %v1864_v0 = vmul.f32 %v2337_v56, %v1863_v60 }
 0x420   : > { %v1879_v1 = vmul.f32 %v2339_v57, %v1878_v61 }
 0x421   : > { %v1865_v3 = vadd.f32 %v2337_v56, %v1864_v0 }
 0x422   : > { %v1880_v5 = vadd.f32 %v2339_v57, %v1879_v1 }
 0x423   : > { %v1869_v8 = vsel %vm1868_vm5, %v2337_v56, %v1865_v3 }
 0x424   : > { %v1884_v7 = vsel %vm1883_vm6, %v2339_v57, %v1880_v5  ;;  %v1874_v13 = vsel %vm1871_vm9, %v1873_v11, %v1869_v8 }
 0x425   : > { %v1889_v9 = vsel %vm1886_vm8, %v1888_v6, %v1884_v7 }
 0x426   : > { %v1902_v12 = vrot.slane %v1889_v9, 4 }
 0x428   : > { %v1907_v14 = vsel %vm1903_vm7, %v1874_v13, %v1902_v12 }
 0x429   : > { %1915 = vst [vmem:[%s2573_s16 + $0x18] sm:$0x77] %v1907_v14 }
 0x42a PF: > { %p14_p9 = scmp.ge.s32.totalorder %s2422_s28, 5   ;;  %s2754_s24 = smov %s2358_s25 }
 0x42b   : > { %s2755_s25 = smov %s2431_s8  ;;  %s2756_s26 = smov %s2422_s28 }
 0x42c   :  { %16 = sbr.rel (!%p14_p9) target bundleno = 2 (0x2), region = 128 }

</bundles_post_ra>
